<compile_context>
chip_gen: v6e
topology: v6e:2x2x1
jax: 0.10.0
libtpu: 0.0.40
codegen_flags: <defaults>
</compile_context>

<pallas_src>
import numpy as np
import jax
import jax.numpy as jnp
from jax.experimental import pallas as pl
from jax.experimental.pallas import tpu as pltpu

OPENAI_CLIP_MEAN = [0.48145466, 0.4578275, 0.40821073]
OPENAI_CLIP_STD = [0.26862954, 0.26130258, 0.27577711]
OUT_H = 224
OUT_W = 224


# --------------------------------------------------------------------------
# Host-side constants
# --------------------------------------------------------------------------
def _bilinear_matrix(in_size: int, out_size: int) -> np.ndarray:
    """Dense (out_size, in_size) bilinear interpolation matrix (align_corners=False)."""
    scale = in_size / out_size
    i = np.arange(out_size, dtype=np.float64)
    src = (i + 0.5) * scale - 0.5
    i0 = np.floor(src).astype(np.int64)
    frac = src - i0
    i1 = i0 + 1
    i0c = np.clip(i0, 0, in_size - 1)
    i1c = np.clip(i1, 0, in_size - 1)
    W = np.zeros((out_size, in_size), dtype=np.float64)
    np.add.at(W, (np.arange(out_size), i0c), 1.0 - frac)
    np.add.at(W, (np.arange(out_size), i1c), frac)
    return W.astype(np.float32)


def _prep_constants(C, Hin, Win):
    """bf16 resize matrices with the CLIP normalization folded into RH / bias."""
    rw_t = _bilinear_matrix(Win, OUT_W).T                              # (Win, 224)
    rh = _bilinear_matrix(Hin, OUT_H)                                  # (224, Hin)
    mean = np.asarray(OPENAI_CLIP_MEAN[:C], np.float32)
    inv_std = np.float32(1.0) / np.asarray(OPENAI_CLIP_STD[:C], np.float32)
    rh_scaled = np.stack([rh * inv_std[c] for c in range(C)], axis=0)  # (C, 224, Hin)
    bias = mean * inv_std                                              # (C,)  = mean/std
    return (jnp.asarray(rw_t, jnp.bfloat16),
            jnp.asarray(rh_scaled, jnp.bfloat16),
            jnp.asarray(bias, jnp.float32))


def _pick_batch_block(B, C, Hin, Win, budget_bytes=8 * 1024 * 1024):
    """Largest divisor of B whose per-step working set fits the VMEM budget."""
    per_img = (C * Hin * Win * 4               # x rows (conservatively f32)
               + C * Hin * OUT_W * 6           # z f32 + bf16 copy
               + 2 * C * OUT_H * OUT_W * 4)    # out block f32 (+ ref block, SSE case)
    bb = max(1, int(budget_bytes // max(per_img, 1)))
    bb = max(1, min(bb, B))
    while B % bb:
        bb -= 1
    return bb


def _vmem_limit_bytes(bb, C, Hin, Win, x_itemsize, with_ref):
    """Scoped VMEM: 2x-buffered blocks + constants + intermediates + slack."""
    x_blk = bb * C * Hin * Win * x_itemsize
    out_blk = bb * C * OUT_H * OUT_W * 4
    ref_blk = out_blk if with_ref else 0
    consts = Win * OUT_W * 2 + C * OUT_H * Hin * 2
    z_tmp = bb * C * Hin * OUT_W * 6
    need = 2 * (x_blk + out_blk + ref_blk + consts) + z_tmp + (4 << 20)
    # Floor at the smallest default (16 MiB, v5e); cap below v7x's 64 MiB physical.
    return int(min(48 << 20, max(need, 16 << 20)))


# --------------------------------------------------------------------------
# Kernel bodies (closures over static bb / C / Hin)
# --------------------------------------------------------------------------
def _make_preprocess_kernel(bb, C, Hin, Win):
    def kernel(bias_ref, x_ref, rwt_ref, rh_ref, o_ref):
        # clamp (in input dtype) then cast to bf16 for native-bf16 MXU passes.
        xb = jnp.clip(x_ref[...], 0.0, 1.0).astype(jnp.bfloat16)       # (bb*C*Hin, Win)
        # width resize: one matmul over all images/channels at once.
        z = jnp.dot(xb, rwt_ref[...],
                    preferred_element_type=jnp.float32)                 # (bb*C*Hin, 224)
        zb = z.astype(jnp.bfloat16)
        # height resize (per image x channel, RH pre-scaled by 1/std[c]),
        # then subtract the folded bias and store one (224, 224) block.
        for g in range(bb * C):                                          # static unroll
            c = g % C
            y = jnp.dot(rh_ref[c], zb[g * Hin:(g + 1) * Hin, :],
                        preferred_element_type=jnp.float32)              # (224, 224)
            o_ref[g * OUT_H:(g + 1) * OUT_H, :] = y - bias_ref[c]
    return kernel


def _make_preprocess_sse_kernel(bb, C, Hin, Win):
    def kernel(bias_ref, x_ref, rwt_ref, rh_ref, ref_ref, o_ref, sse_ref):
        @pl.when(pl.program_id(0) == 0)
        def _init():
            sse_ref[...] = jnp.zeros_like(sse_ref)

        xb = jnp.clip(x_ref[...], 0.0, 1.0).astype(jnp.bfloat16)
        z = jnp.dot(xb, rwt_ref[...], preferred_element_type=jnp.float32)
        zb = z.astype(jnp.bfloat16)
        total = jnp.float32(0.0)
        for g in range(bb * C):                                           # static unroll
            c = g % C
            y = jnp.dot(rh_ref[c], zb[g * Hin:(g + 1) * Hin, :],
                        preferred_element_type=jnp.float32) - bias_ref[c]
            o_ref[g * OUT_H:(g + 1) * OUT_H, :] = y
            d = y - ref_ref[g * OUT_H:(g + 1) * OUT_H, :]
            total = total + jnp.sum(d * d)
        # Lane-dense accumulator block (resident across steps); every lane
        # ends up holding the full SSE.  (SMEM scalar output is the alternative.)
        sse_ref[...] = sse_ref[...] + jnp.broadcast_to(total, sse_ref.shape)
    return kernel


# --------------------------------------------------------------------------
# Wrappers
# --------------------------------------------------------------------------
def clip_preprocess(x: jnp.ndarray) -> jnp.ndarray:
    """x: (B, 3, Hin, Win) float (~[0,1]) -> (B, 3, 224, 224) CLIP pixel_values (f32)."""
    B, C, Hin, Win = x.shape
    rwt, rh, bias = _prep_constants(C, Hin, Win)
    bb = _pick_batch_block(B, C, Hin, Win)
    nb = B // bb
    x2d = x.reshape(B * C * Hin, Win)          # contiguous, free; dtype kept (f32/bf16/...)

    out = pl.pallas_call(
        _make_preprocess_kernel(bb, C, Hin, Win),
        out_shape=jax.ShapeDtypeStruct((B * C * OUT_H, OUT_W), jnp.float32),
        grid=(nb,),
        in_specs=[
            pl.BlockSpec(memory_space=pltpu.MemorySpace.SMEM),            # bias (C,)
            pl.BlockSpec((bb * C * Hin, Win), lambda i: (i, 0)),          # x rows
            pl.BlockSpec((Win, OUT_W), lambda i: (0, 0)),                 # RW^T (bf16)
            pl.BlockSpec((C, OUT_H, Hin), lambda i: (0, 0, 0)),           # RH*inv_std (bf16)
        ],
        out_specs=pl.BlockSpec((bb * C * OUT_H, OUT_W), lambda i: (i, 0)),
        compiler_params=pltpu.CompilerParams(
            # parallel batch-chunk axis: sharded over both TCs on v7x when nb >= 2.
            dimension_semantics=("parallel",),
            vmem_limit_bytes=_vmem_limit_bytes(bb, C, Hin, Win,
                                               x.dtype.itemsize, with_ref=False)),
    )(bias, x2d, rwt, rh)
    return out.reshape(B, C, OUT_H, OUT_W)


def clip_preprocess_and_sse(x: jnp.ndarray, ref_pixel_values: jnp.ndarray):
    """Fused: pixel_values plus sum((pixel_values - ref)**2) in one launch."""
    B, C, Hin, Win = x.shape
    rwt, rh, bias = _prep_constants(C, Hin, Win)
    bb = _pick_batch_block(B, C, Hin, Win)
    nb = B // bb
    x2d = x.reshape(B * C * Hin, Win)
    ref2d = ref_pixel_values.astype(jnp.float32).reshape(B * C * OUT_H, OUT_W)

    out, sse_vec = pl.pallas_call(
        _make_preprocess_sse_kernel(bb, C, Hin, Win),
        out_shape=(
            jax.ShapeDtypeStruct((B * C * OUT_H, OUT_W), jnp.float32),
            jax.ShapeDtypeStruct((1, 128), jnp.float32),
        ),
        grid=(nb,),
        in_specs=[
            pl.BlockSpec(memory_space=pltpu.MemorySpace.SMEM),            # bias (C,)
            pl.BlockSpec((bb * C * Hin, Win), lambda i: (i, 0)),          # x rows
            pl.BlockSpec((Win, OUT_W), lambda i: (0, 0)),                 # RW^T
            pl.BlockSpec((C, OUT_H, Hin), lambda i: (0, 0, 0)),           # RH*inv_std
            pl.BlockSpec((bb * C * OUT_H, OUT_W), lambda i: (i, 0)),      # reference
        ],
        out_specs=(
            pl.BlockSpec((bb * C * OUT_H, OUT_W), lambda i: (i, 0)),
            pl.BlockSpec((1, 128), lambda i: (0, 0)),                     # SSE accumulator
        ),
        compiler_params=pltpu.CompilerParams(
            # SSE block is revisited across steps -> keep the axis "arbitrary".
            dimension_semantics=("arbitrary",),
            vmem_limit_bytes=_vmem_limit_bytes(bb, C, Hin, Win,
                                               x.dtype.itemsize, with_ref=True)),
    )(bias, x2d, rwt, rh, ref2d)
    return out.reshape(B, C, OUT_H, OUT_W), sse_vec[0, 0]


# --------------------------------------------------------------------------
# Plain-JAX references
# --------------------------------------------------------------------------
def _reference_preprocess(x):
    """Full-f32 reference of the same normalizer (bilinear resize + CLIP normalize)."""
    B, C, Hin, Win = x.shape
    rh = jnp.asarray(_bilinear_matrix(Hin, OUT_H))
    rw = jnp.asarray(_bilinear_matrix(Win, OUT_W))
    xc = jnp.clip(x.astype(jnp.float32), 0.0, 1.0)
    y = jnp.einsum("oh,bchw,pw->bcop", rh, xc, rw,
                   precision=jax.lax.Precision.HIGHEST)
    mean = jnp.asarray(OPENAI_CLIP_MEAN, jnp.float32).reshape(1, C, 1, 1)
    std = jnp.asarray(OPENAI_CLIP_STD, jnp.float32).reshape(1, C, 1, 1)
    return (y - mean) / std


def _matched_reference(x):
    """Plain-JAX replica of the kernel's exact bf16-operand arithmetic."""
    B, C, Hin, Win = x.shape
    rwt_bf, rh_bf, bias = _prep_constants(C, Hin, Win)
    xb = jnp.clip(x.astype(jnp.float32), 0.0, 1.0).astype(jnp.bfloat16)
    z = jnp.dot(xb.reshape(B * C * Hin, Win), rwt_bf,
                preferred_element_type=jnp.float32).astype(jnp.bfloat16)
    z = z.reshape(B, C, Hin, OUT_W)
    chans = []
    for c in range(C):
        yc = jnp.einsum("oh,bhw->bow", rh_bf[c], z[:, c],
                        preferred_element_type=jnp.float32) - bias[c]
        chans.append(yc)
    return jnp.stack(chans, axis=1)


if __name__ == "__main__":
    key = jax.random.PRNGKey(0)
    # Small input consistent with the module: batch=2, RGB, 16x16 spatial,
    # values slightly outside [0,1] so the clamp matters.
    x = jax.random.uniform(key, (2, 3, 16, 16), dtype=jnp.float32,
                           minval=-0.1, maxval=1.1)

    pv = jax.block_until_ready(clip_preprocess(x))
    ref_f32 = jax.block_until_ready(_reference_preprocess(x))
    ref_bf16 = jax.block_until_ready(_matched_reference(x))

    # 1) Kernel implements its intended (bf16-matmul, f32-accumulate) math exactly.
    np.testing.assert_allclose(np.asarray(pv), np.asarray(ref_bf16),
                               atol=1e-3, rtol=1e-3)
    # 2) And stays within bf16-operand quantization of the full-f32 pipeline.
    np.testing.assert_allclose(np.asarray(pv), np.asarray(ref_f32),
                               atol=4e-2, rtol=0)

    # 3) Fused pixel_values + SSE diagnostic in one launch.
    pv_fused, sse = clip_preprocess_and_sse(x, ref_f32)
    pv_fused = jax.block_until_ready(pv_fused)
    sse = float(jax.block_until_ready(sse))
    np.testing.assert_allclose(np.asarray(pv_fused), np.asarray(pv),
                               atol=1e-5, rtol=1e-5)
    sse_plain = float(jnp.sum((pv_fused - ref_f32) ** 2))
    np.testing.assert_allclose(sse, sse_plain, rtol=5e-3, atol=1e-5)

    print("KERNEL_OK")
</pallas_src>

<mosaic_0001>
module attributes {stable_mosaic.version = 11 : i64} {
  func.func @kernel(%arg0: i32, %arg1: memref<3xf32, #tpu.memory_space<smem>>, %arg2: memref<96x16xf32, #tpu.memory_space<vmem>>, %arg3: memref<16x224xbf16, #tpu.memory_space<vmem>>, %arg4: memref<3x224x16xbf16, #tpu.memory_space<vmem>>, %arg5: memref<1344x224xf32, #tpu.memory_space<vmem>>) attributes {dimension_semantics = [#tpu.dimension_semantics<parallel>], iteration_bounds = array<i64: 1>, scalar_prefetch = 0 : i64, scratch_operands = 0 : i64, tpu.core_type = #tpu.core_type<tc>, window_params = [{transform_indices = @transform_0, window_bounds = array<i64: 3>}, {transform_indices = @transform_1, window_bounds = array<i64: 96, 16>}, {pipeline_mode = #tpu.pipeline_mode<synchronous>, transform_indices = @transform_2, window_bounds = array<i64: 16, 224>}, {pipeline_mode = #tpu.pipeline_mode<synchronous>, transform_indices = @transform_3, window_bounds = array<i64: 3, 224, 16>}, {transform_indices = @transform_4, window_bounds = array<i64: 1344, 224>}]} {
    %c0 = arith.constant 0 : index
    %c0_0 = arith.constant 0 : index
    %0 = vector.load %arg2[%c0, %c0_0] : memref<96x16xf32, #tpu.memory_space<vmem>>, vector<96x16xf32>
    %cst = arith.constant 0.000000e+00 : f32
    %cst_1 = arith.constant 1.000000e+00 : f32
    %1 = vector.broadcast %cst : f32 to vector<96x16xf32>
    %2 = arith.maximumf %1, %0 : vector<96x16xf32>
    %3 = vector.broadcast %cst_1 : f32 to vector<96x16xf32>
    %4 = arith.minimumf %3, %2 : vector<96x16xf32>
    %5 = arith.truncf %4 : vector<96x16xf32> to vector<96x16xbf16>
    %c0_2 = arith.constant 0 : index
    %c0_3 = arith.constant 0 : index
    %6 = vector.load %arg3[%c0_2, %c0_3] : memref<16x224xbf16, #tpu.memory_space<vmem>>, vector<16x224xbf16>
    %cst_4 = arith.constant dense<0.000000e+00> : vector<96x224xf32>
    %7 = tpu.matmul %5, %6, %cst_4 {dimension_numbers = #tpu.dot_dimension_numbers<[1], [0], [0], [1], [0, 0, 1, 1], [], []>} : vector<96x16xbf16>, vector<16x224xbf16>, vector<96x224xf32> -> vector<96x224xf32>
    %8 = arith.truncf %7 : vector<96x224xf32> to vector<96x224xbf16>
    %c0_5 = arith.constant 0 : index
    %c0_6 = arith.constant 0 : index
    %c0_7 = arith.constant 0 : index
    %9 = vector.load %arg4[%c0_5, %c0_6, %c0_7] : memref<3x224x16xbf16, #tpu.memory_space<vmem>>, vector<1x224x16xbf16>
    %10 = vector.shape_cast %9 : vector<1x224x16xbf16> to vector<224x16xbf16>
    %11 = vector.extract_strided_slice %8 {offsets = [0, 0], sizes = [16, 224], strides = [1, 1]} : vector<96x224xbf16> to vector<16x224xbf16>
    %cst_8 = arith.constant dense<0.000000e+00> : vector<224x224xf32>
    %12 = tpu.matmul %10, %11, %cst_8 {dimension_numbers = #tpu.dot_dimension_numbers<[1], [0], [0], [1], [0, 0, 1, 1], [], []>} : vector<224x16xbf16>, vector<16x224xbf16>, vector<224x224xf32> -> vector<224x224xf32>
    %c0_9 = arith.constant 0 : index
    %13 = memref.load %arg1[%c0_9] : memref<3xf32, #tpu.memory_space<smem>>
    %14 = vector.broadcast %13 : f32 to vector<224x224xf32>
    %15 = arith.subf %12, %14 : vector<224x224xf32>
    %c0_10 = arith.constant 0 : index
    %c0_11 = arith.constant 0 : index
    %16 = vector.load %arg5[%c0_10, %c0_11] : memref<1344x224xf32, #tpu.memory_space<vmem>>, vector<224x224xf32>
    tpu.vector_store %arg5[%c0_10, %c0_11], %15 {strides = array<i32>} : memref<1344x224xf32, #tpu.memory_space<vmem>>, vector<224x224xf32>,
    %c1 = arith.constant 1 : index
    %c0_12 = arith.constant 0 : index
    %c0_13 = arith.constant 0 : index
    %17 = vector.load %arg4[%c1, %c0_12, %c0_13] : memref<3x224x16xbf16, #tpu.memory_space<vmem>>, vector<1x224x16xbf16>
    %18 = vector.shape_cast %17 : vector<1x224x16xbf16> to vector<224x16xbf16>
    %19 = vector.extract_strided_slice %8 {offsets = [16, 0], sizes = [16, 224], strides = [1, 1]} : vector<96x224xbf16> to vector<16x224xbf16>
    %cst_14 = arith.constant dense<0.000000e+00> : vector<224x224xf32>
    %20 = tpu.matmul %18, %19, %cst_14 {dimension_numbers = #tpu.dot_dimension_numbers<[1], [0], [0], [1], [0, 0, 1, 1], [], []>} : vector<224x16xbf16>, vector<16x224xbf16>, vector<224x224xf32> -> vector<224x224xf32>
    %c1_15 = arith.constant 1 : index
    %21 = memref.load %arg1[%c1_15] : memref<3xf32, #tpu.memory_space<smem>>
    %22 = vector.broadcast %21 : f32 to vector<224x224xf32>
    %23 = arith.subf %20, %22 : vector<224x224xf32>
    %c224 = arith.constant 224 : index
    %c0_16 = arith.constant 0 : index
    %24 = vector.load %arg5[%c224, %c0_16] : memref<1344x224xf32, #tpu.memory_space<vmem>>, vector<224x224xf32>
    tpu.vector_store %arg5[%c224, %c0_16], %23 {strides = array<i32>} : memref<1344x224xf32, #tpu.memory_space<vmem>>, vector<224x224xf32>,
    %c2 = arith.constant 2 : index
    %c0_17 = arith.constant 0 : index
    %c0_18 = arith.constant 0 : index
    %25 = vector.load %arg4[%c2, %c0_17, %c0_18] : memref<3x224x16xbf16, #tpu.memory_space<vmem>>, vector<1x224x16xbf16>
    %26 = vector.shape_cast %25 : vector<1x224x16xbf16> to vector<224x16xbf16>
    %27 = vector.extract_strided_slice %8 {offsets = [32, 0], sizes = [16, 224], strides = [1, 1]} : vector<96x224xbf16> to vector<16x224xbf16>
    %cst_19 = arith.constant dense<0.000000e+00> : vector<224x224xf32>
    %28 = tpu.matmul %26, %27, %cst_19 {dimension_numbers = #tpu.dot_dimension_numbers<[1], [0], [0], [1], [0, 0, 1, 1], [], []>} : vector<224x16xbf16>, vector<16x224xbf16>, vector<224x224xf32> -> vector<224x224xf32>
    %c2_20 = arith.constant 2 : index
    %29 = memref.load %arg1[%c2_20] : memref<3xf32, #tpu.memory_space<smem>>
    %30 = vector.broadcast %29 : f32 to vector<224x224xf32>
    %31 = arith.subf %28, %30 : vector<224x224xf32>
    %c448 = arith.constant 448 : index
    %c0_21 = arith.constant 0 : index
    %32 = vector.load %arg5[%c448, %c0_21] : memref<1344x224xf32, #tpu.memory_space<vmem>>, vector<224x224xf32>
    tpu.vector_store %arg5[%c448, %c0_21], %31 {strides = array<i32>} : memref<1344x224xf32, #tpu.memory_space<vmem>>, vector<224x224xf32>,
    %c0_22 = arith.constant 0 : index
    %c0_23 = arith.constant 0 : index
    %c0_24 = arith.constant 0 : index
    %33 = vector.load %arg4[%c0_22, %c0_23, %c0_24] : memref<3x224x16xbf16, #tpu.memory_space<vmem>>, vector<1x224x16xbf16>
    %34 = vector.shape_cast %33 : vector<1x224x16xbf16> to vector<224x16xbf16>
    %35 = vector.extract_strided_slice %8 {offsets = [48, 0], sizes = [16, 224], strides = [1, 1]} : vector<96x224xbf16> to vector<16x224xbf16>
    %cst_25 = arith.constant dense<0.000000e+00> : vector<224x224xf32>
    %36 = tpu.matmul %34, %35, %cst_25 {dimension_numbers = #tpu.dot_dimension_numbers<[1], [0], [0], [1], [0, 0, 1, 1], [], []>} : vector<224x16xbf16>, vector<16x224xbf16>, vector<224x224xf32> -> vector<224x224xf32>
    %c0_26 = arith.constant 0 : index
    %37 = memref.load %arg1[%c0_26] : memref<3xf32, #tpu.memory_space<smem>>
    %38 = vector.broadcast %37 : f32 to vector<224x224xf32>
    %39 = arith.subf %36, %38 : vector<224x224xf32>
    %c672 = arith.constant 672 : index
    %c0_27 = arith.constant 0 : index
    %40 = vector.load %arg5[%c672, %c0_27] : memref<1344x224xf32, #tpu.memory_space<vmem>>, vector<224x224xf32>
    tpu.vector_store %arg5[%c672, %c0_27], %39 {strides = array<i32>} : memref<1344x224xf32, #tpu.memory_space<vmem>>, vector<224x224xf32>,
    %c1_28 = arith.constant 1 : index
    %c0_29 = arith.constant 0 : index
    %c0_30 = arith.constant 0 : index
    %41 = vector.load %arg4[%c1_28, %c0_29, %c0_30] : memref<3x224x16xbf16, #tpu.memory_space<vmem>>, vector<1x224x16xbf16>
    %42 = vector.shape_cast %41 : vector<1x224x16xbf16> to vector<224x16xbf16>
    %43 = vector.extract_strided_slice %8 {offsets = [64, 0], sizes = [16, 224], strides = [1, 1]} : vector<96x224xbf16> to vector<16x224xbf16>
    %cst_31 = arith.constant dense<0.000000e+00> : vector<224x224xf32>
    %44 = tpu.matmul %42, %43, %cst_31 {dimension_numbers = #tpu.dot_dimension_numbers<[1], [0], [0], [1], [0, 0, 1, 1], [], []>} : vector<224x16xbf16>, vector<16x224xbf16>, vector<224x224xf32> -> vector<224x224xf32>
    %c1_32 = arith.constant 1 : index
    %45 = memref.load %arg1[%c1_32] : memref<3xf32, #tpu.memory_space<smem>>
    %46 = vector.broadcast %45 : f32 to vector<224x224xf32>
    %47 = arith.subf %44, %46 : vector<224x224xf32>
    %c896 = arith.constant 896 : index
    %c0_33 = arith.constant 0 : index
    %48 = vector.load %arg5[%c896, %c0_33] : memref<1344x224xf32, #tpu.memory_space<vmem>>, vector<224x224xf32>
    tpu.vector_store %arg5[%c896, %c0_33], %47 {strides = array<i32>} : memref<1344x224xf32, #tpu.memory_space<vmem>>, vector<224x224xf32>,
    %c2_34 = arith.constant 2 : index
    %c0_35 = arith.constant 0 : index
    %c0_36 = arith.constant 0 : index
    %49 = vector.load %arg4[%c2_34, %c0_35, %c0_36] : memref<3x224x16xbf16, #tpu.memory_space<vmem>>, vector<1x224x16xbf16>
    %50 = vector.shape_cast %49 : vector<1x224x16xbf16> to vector<224x16xbf16>
    %51 = vector.extract_strided_slice %8 {offsets = [80, 0], sizes = [16, 224], strides = [1, 1]} : vector<96x224xbf16> to vector<16x224xbf16>
    %cst_37 = arith.constant dense<0.000000e+00> : vector<224x224xf32>
    %52 = tpu.matmul %50, %51, %cst_37 {dimension_numbers = #tpu.dot_dimension_numbers<[1], [0], [0], [1], [0, 0, 1, 1], [], []>} : vector<224x16xbf16>, vector<16x224xbf16>, vector<224x224xf32> -> vector<224x224xf32>
    %c2_38 = arith.constant 2 : index
    %53 = memref.load %arg1[%c2_38] : memref<3xf32, #tpu.memory_space<smem>>
    %54 = vector.broadcast %53 : f32 to vector<224x224xf32>
    %55 = arith.subf %52, %54 : vector<224x224xf32>
    %c1120 = arith.constant 1120 : index
    %c0_39 = arith.constant 0 : index
    %56 = vector.load %arg5[%c1120, %c0_39] : memref<1344x224xf32, #tpu.memory_space<vmem>>, vector<224x224xf32>
    tpu.vector_store %arg5[%c1120, %c0_39], %55 {strides = array<i32>} : memref<1344x224xf32, #tpu.memory_space<vmem>>, vector<224x224xf32>,
    return
  }
  func.func @transform_0(%arg0: i32) -> i32 {
    %c0_i32 = arith.constant 0 : i32
    %c0_i32_0 = arith.constant 0 : i32
    return %c0_i32 : i32
  }
  func.func @transform_1(%arg0: i32) -> (i32, i32) {
    %c0_i32 = arith.constant 0 : i32
    %c0_i32_0 = arith.constant 0 : i32
    return %arg0, %c0_i32 : i32, i32
  }
  func.func @transform_2(%arg0: i32) -> (i32, i32) {
    %c0_i32 = arith.constant 0 : i32
    %c0_i32_0 = arith.constant 0 : i32
    %c0_i32_1 = arith.constant 0 : i32
    return %c0_i32, %c0_i32_0 : i32, i32
  }
  func.func @transform_3(%arg0: i32) -> (i32, i32, i32) {
    %c0_i32 = arith.constant 0 : i32
    %c0_i32_0 = arith.constant 0 : i32
    %c0_i32_1 = arith.constant 0 : i32
    %c0_i32_2 = arith.constant 0 : i32
    return %c0_i32, %c0_i32_0, %c0_i32_1 : i32, i32, i32
  }
  func.func @transform_4(%arg0: i32) -> (i32, i32) {
    %c0_i32 = arith.constant 0 : i32
    %c0_i32_0 = arith.constant 0 : i32
    return %arg0, %c0_i32 : i32, i32
  }
}

</mosaic_0001>

<bundles_post_ra>
// kernel: tpu_custom_call.1
= control target key start
LH: loop header
LB: loop body
LE: loop exit
PB: predicated region body
PF: predicated region fallthrough
CT: control target
= control target key end

     0   :  { %9 = vsyncpa [#allocation4], 0  ;;  %s5255_s0 = inlined_call_operand.hbm [shape: f32[3], index: 0, kind: input, shape index: {}]   ;;  %s5256_s1 = inlined_call_operand.vmem [shape: f32[96,16], index: 1, kind: input, shape index: {}]   ;;  %s5257_s2 = inlined_call_operand.hbm [shape: bf16[16,224], index: 2, kind: input, shape index: {}]   ;;  %s5258_s3 = inlined_call_operand.vmem [shape: bf16[3,224,16], index: 3, kind: input, shape index: {}]   ;;  %s5259_s4 = inlined_call_operand.vmem [shape: f32[1344,224], index: 4, kind: output, shape index: {}]  }
   0x1   :  { %10 = vsyncpa [#allocation3], 0  ;;  %s3210_s15 = smov [#allocation2]   ;;  %s3211_s18 = smov [#allocation5]  }
   0x2   :  { %18 = dma.hbm_to_smem %s5255_s0, 16, %s3210_s15, [#allocation4]  }
   0x3   :  { %s26_s19 = sshll.u32 %s3211_s18, 4  ;;  %s27_s19 = int_to_ptr.vmem [resolvable:$true] %s26_s19 }
   0x4   :  { %s3194_s20 = scalar_lea.vmem %s27_s19, 256  ;;  %p3199_p1 = scmp.lt.s32.totalorder %s27_s19, %s27_s19 }
   0x5   :  { %p3195_p0 = scmp.ne.s32.totalorder %s27_s19, %s3194_s20  ;;  %p3200_p2 = scmp.lt.s32.totalorder %s3194_s20, %s3194_s20 }
   0x7   :  { %p3201_p3 = por %p3200_p2, %p3199_p1 }
   0x9   :  { %p3202_p4 = pnand %p3201_p3, %p3195_p0 }
   0xb   :  { %3205 = shalt.err (!%p3202_p4)
}
   0xc   :  { %s3212_s21 = smov 128   ;;  %s3213_s22 = smov 8  }
   0xd   :  { %32 = dma.hbm_to_vmem [thread:$0]  %s5257_s2, 256, %s27_s19, [#allocation3], %s3212_s21, %s3212_s21, %s3213_s22  }
   0xe   :  { %3206 = dma.done.wait [#allocation4], 16  }
   0xf   :  { %3207 = vsyncadd [#allocation4], 4294967280 }
  0x10   :  { %3208 = dma.done.wait [#allocation3], 256  }
  0x11   :  { %3209 = vsyncadd [#allocation3], 4294967040 }
  0x12   :  { %41 = sfence }
  0x13   :  { %v3091_v0 = vld [vmem:[#allocation5 + $0x4] ss:$8 sps:$4 sm:$0xff]   ;;  %v3093_v1 = vld [vmem:[#allocation5] ss:$8 sps:$4 sm:$0xff]   ;;  %v3214_v2 = vmov 0   ;;  %v45_v7 = vld [vmem:[%s5256_s1 + $0x10] sm:$0xff] }
  0x14   :  { %148 = vmatprep.mubr.bf16.mxu0 %v3214_v2  ;;  %v43_v3 = vld [vmem:[%s5256_s1] sm:$0xff]  ;;  %v44_v4 = vld [vmem:[%s5256_s1 + $0x8] sm:$0xff]  ;;  %178 = vmatprep.mubr.bf16.mxu1 %v3214_v2  ;;  %v46_v8 = vld [vmem:[%s5256_s1 + $0x18] sm:$0xff]  ;;  %v57_v10 = vmax.f32 %v45_v7, 0.0  ;;  %vm97_vm0 = vcmask 130048   ;;  %s534_s26 = sld [smem:[#allocation2]] }
  0x15   :  { %130 = vmatprep.subr.bf16.mxu0 %v3091_v0  ;;  %v55_v5 = vmax.f32 %v43_v3, 0.0  ;;  %v56_v6 = vmax.f32 %v44_v4, 0.0  ;;  %3084 = vmatprep.subr.bf16.mxu1 %v3091_v0  ;;  %v47_v9 = vld [vmem:[%s5256_s1 + $0x20] sm:$0xff]  ;;  %v58_v11 = vmax.f32 %v46_v8, 0.0  ;;  %v48_v12 = vld [vmem:[%s5256_s1 + $0x28] sm:$0xff]  ;;  %v49_v14 = vld [vmem:[%s5256_s1 + $0x30] sm:$0xff] }
  0x16   :  { %131 = vmatpush1.bf16.msra.mxu0 %v3093_v1  ;;  %3085 = vmatpush1.bf16.msra.mxu1 %v3093_v1  ;;  %v59_v13 = vmax.f32 %v47_v9, 0.0  ;;  %v50_v15 = vld [vmem:[%s5256_s1 + $0x38] sm:$0xff]  ;;  %v60_v18 = vmax.f32 %v48_v12, 0.0  ;;  %v61_v19 = vmax.f32 %v49_v14, 0.0  ;;  %v51_v20 = vld [vmem:[%s5256_s1 + $0x40] sm:$0xff]  ;;  %v52_v21 = vld [vmem:[%s5256_s1 + $0x48] sm:$0xff] }
  0x17   :  { %v67_v16 = vmin.f32 %v55_v5, 1.0  ;;  %v68_v17 = vmin.f32 %v56_v6, 1.0  ;;  %v69_v22 = vmin.f32 %v57_v10, 1.0  ;;  %v62_v23 = vmax.f32 %v50_v15, 0.0  ;;  %v53_v24 = vld [vmem:[%s5256_s1 + $0x50] sm:$0xff]  ;;  %v54_v25 = vld [vmem:[%s5256_s1 + $0x58] sm:$0xff] }
  0x18   :  { %v70_v27 = vmin.f32 %v58_v11, 1.0  ;;  %v73_v28 = vmin.f32 %v61_v19, 1.0  ;;  %v63_v29 = vmax.f32 %v51_v20, 0.0  ;;  %v71_v30 = vmin.f32 %v59_v13, 1.0  ;;  %v3094_v55 = vld [vmem:[%s5258_s3] sm:$0xff]   ;;  %v3095_v5 = vld [vmem:[%s5258_s3 + $0x8] sm:$0xff]  }
  0x19   :  { %v79_v26 = vpack.c.bf16 %v68_v17, %v67_v16  ;;  %v74_v31 = vmin.f32 %v62_v23, 1.0  ;;  %v64_v32 = vmax.f32 %v52_v21, 0.0  ;;  %v65_v33 = vmax.f32 %v53_v24, 0.0  ;;  %v3096_v6 = vld [vmem:[%s5258_s3 + $0x70] sm:$0xff]   ;;  %v3098_v20 = vld [vmem:[%s5258_s3 + $0x78] sm:$0xff]   ;;  %v3100_v24 = vld [vmem:[%s5258_s3 + $0x80] sm:$0xff]  }
  0x1a   :  { %v72_v34 = vmin.f32 %v60_v18, 1.0  ;;  %v66_v35 = vmax.f32 %v54_v25, 0.0  ;;  %v75_v37 = vmin.f32 %v63_v29, 1.0  ;;  %v80_v41 = vpack.c.bf16 %v70_v27, %v69_v22  ;;  %v3097_v19 = vld [vmem:[%s5258_s3 + $0x10] sm:$0xff]   ;;  %v3099_v23 = vld [vmem:[%s5258_s3 + $0x18] sm:$0xff]   ;;  %v3101_v25 = vld [vmem:[%s5258_s3 + $0x20] sm:$0xff]  }
  0x1b   :  { %2794 = vmatmul.mubr.msk.bf16.vlgmr.msra.gmra.mxu0 %vm97_vm0, %v79_v26  ;;  %v82_v36 = vpack.c.bf16 %v74_v31, %v73_v28  ;;  %v76_v38 = vmin.f32 %v64_v32, 1.0  ;;  %v77_v39 = vmin.f32 %v65_v33, 1.0  ;;  %v3102_v26 = vld [vmem:[%s5258_s3 + $0x88] sm:$0xff]   ;;  %v3104_v28 = vld [vmem:[%s5258_s3 + $0x90] sm:$0xff]   ;;  %v3107_v31 = vld [vmem:[%s5258_s3 + $0x38] sm:$0xff]   ;;  %s2884_s30 = sld [smem:[#allocation2 + $0x1]] }
  0x1c   :  { %158 = vmatprep.mubr.bf16.mxu0 %v3214_v2  ;;  %v78_v40 = vmin.f32 %v66_v35, 1.0  ;;  %v81_v43 = vpack.c.bf16 %v72_v34, %v71_v30  ;;  %v3103_v27 = vld [vmem:[%s5258_s3 + $0x28] sm:$0xff]   ;;  %v3105_v29 = vld [vmem:[%s5258_s3 + $0x30] sm:$0xff]   ;;  %v3106_v30 = vld [vmem:[%s5258_s3 + $0x98] sm:$0xff]   ;;  %vm593_vm1 = vcmask 785408   ;;  %s4123_s17 = sld [smem:[#allocation2 + $0x2]] }
  0x1d   :  { %2797 = vmatmul.mubr.msk.bf16.vlgmr.msra.gmra.mxu1 %vm97_vm0, %v82_v36  ;;  %v83_v42 = vpack.c.bf16 %v76_v38, %v75_v37  ;;  %v3108_v32 = vld [vmem:[%s5258_s3 + $0xa0] sm:$0xff]   ;;  %v3110_v34 = vld [vmem:[%s5258_s3 + $0xa8] sm:$0xff]   ;;  %v3112_v36 = vld [vmem:[%s5258_s3 + $0xb0] sm:$0xff]   ;;  %s3026_s22 = sld [smem:[#allocation2 + $0x1]] }
  0x1e   :  { %188 = vmatprep.mubr.bf16.mxu1 %v3214_v2  ;;  %v84_v44 = vpack.c.bf16 %v78_v40, %v77_v39  ;;  %v3109_v33 = vld [vmem:[%s5258_s3 + $0x40] sm:$0xff]   ;;  %v3111_v35 = vld [vmem:[%s5258_s3 + $0x48] sm:$0xff]   ;;  %v3113_v37 = vld [vmem:[%s5258_s3 + $0x50] sm:$0xff]  }
  0x1f   :  { %v3114_v38 = vld [vmem:[%s5258_s3 + $0xb8] sm:$0xff]   ;;  %v3116_v40 = vld [vmem:[%s5258_s3 + $0xc0] sm:$0xff]  }
  0x20   :  { %v3115_v39 = vld [vmem:[%s5258_s3 + $0x58] sm:$0xff]  }
  0x23   :  { %2795 = vmatmul.mubr.msk.bf16.gmra.mxu0 %vm97_vm0, %v80_v41  ;;  %v3117_v41 = vld [vmem:[%s5258_s3 + $0x60] sm:$0xff]  }
  0x24   :  { %168 = vmatprep.mubr.bf16.mxu0 %v3214_v2 }
  0x25   :  { %2798 = vmatmul.mubr.msk.bf16.gmra.mxu1 %vm97_vm0, %v83_v42  ;;  %v3118_v42 = vld [vmem:[%s5258_s3 + $0xc8] sm:$0xff]  }
  0x26   :  { %198 = vmatprep.mubr.bf16.mxu1 %v3214_v2 }
  0x2b   :  { %2796 = vmatmul.mubr.msk.bf16.gmra.mxu0 %vm97_vm0, %v81_v43  ;;  %v3119_v43 = vld [vmem:[%s5258_s3 + $0x68] sm:$0xff]  }
  0x2c   :  { %822 = vmatprep.mubr.bf16.mxu0 %v3214_v2 }
  0x2d   :  { %2799 = vmatmul.mubr.msk.bf16.gmra.mxu1 %vm97_vm0, %v84_v44  ;;  %v3120_v44 = vld [vmem:[%s5258_s3 + $0xd0] sm:$0xff]  }
  0x2e   :  { %393 = vmatprep.mubr.bf16.mxu1 %v3214_v2 }
  0xdb   :  { %v150_v45 = vpop.f32.mrf.mxu0 }
  0xdd   :  { %v152_v46 = vpop.f32.mrf.mxu0  ;;  %v180_v47 = vpop.f32.mrf.mxu1 }
  0xdf   :  { %v154_v48 = vpop.f32.mrf.mxu0  ;;  %v182_v49 = vpop.f32.mrf.mxu1 }
  0xe0   :  { %v209_v53 = vpack.c.bf16 %v154_v48, %v150_v45  ;;  %v3121_v45 = vld [vmem:[%s5258_s3 + $0xd8] sm:$0xff]   ;;  %v3124_v48 = vld [vmem:[%s5258_s3 + $0xe8] sm:$0xff]  }
  0xe1   :  { %v156_v50 = vpop.f32.mrf.mxu0  ;;  %v184_v52 = vpop.f32.mrf.mxu1 }
  0xe2   :  { %v210_v51 = vpack.c.bf16 %v156_v50, %v152_v46  ;;  %v215_v9 = vpack.c.bf16 %v184_v52, %v180_v47  ;;  %v3122_v46 = vld [vmem:[%s5258_s3 + $0xe0] sm:$0xff]   ;;  %v3126_v50 = vld [vmem:[%s5258_s3 + $0xf0] sm:$0xff]   ;;  %v3128_v52 = vld [vmem:[%s5258_s3 + $0xf8] sm:$0xff]  }
  0xe3   :  { %v160_v54 = vpop.f32.mrf.mxu0  ;;  %v186_v56 = vpop.f32.mrf.mxu1  ;;  %v3123_v47 = vld [vmem:[%s5258_s3] sm:$0xff]  }
  0xe4   :  { %375 = vmatprep.subr.bf16.mxu1 %v210_v51  ;;  %v216_v63 = vpack.c.bf16 %v186_v56, %v182_v49  ;;  %v3125_v49 = vld [vmem:[%s5258_s3 + $0x8] sm:$0xff]   ;;  %v3127_v51 = vld [vmem:[%s5258_s3 + $0x10] sm:$0xff]  }
  0xe5   :  { %v162_v57 = vpop.f32.mrf.mxu0  ;;  %376 = vmatpush1.bf16.msra.mxu1 %v209_v53  ;;  %v3299_v58 = vpop.f32.mrf.mxu1  ;;  %v3129_v53 = vld [vmem:[%s5258_s3 + $0x18] sm:$0xff]   ;;  %v3132_v56 = vld [vmem:[%s5258_s3 + $0x108] sm:$0xff]  }
  0xe7   :  { %v164_v59 = vpop.f32.mrf.mxu0  ;;  %v192_v60 = vpop.f32.mrf.mxu1 }
  0xe8   :  { %2814 = vmatmul.mubr.msk.bf16.vlgmr.msra.gmra.mxu1 %vm97_vm0, %v3094_v55  ;;  %v211_v1 = vpack.c.bf16 %v164_v59, %v160_v54  ;;  %v3130_v54 = vld [vmem:[%s5258_s3 + $0x100] sm:$0xff]   ;;  %v3135_v59 = vld [vmem:[%s5258_s3 + $0x30] sm:$0xff]  }
  0xe9   :  { %v166_v61 = vpop.f32.mrf.mxu0  ;;  %403 = vmatprep.mubr.bf16.mxu1 %v3214_v2  ;;  %v3303_v0 = vpop.f32.mrf.mxu1  ;;  %v3131_v55 = vld [vmem:[%s5258_s3 + $0x20] sm:$0xff]  }
  0xea   :  { %v212_v62 = vpack.c.bf16 %v166_v61, %v162_v57  ;;  %v217_v4 = vpack.c.bf16 %v3303_v0, %v3299_v58  ;;  %v3133_v57 = vld [vmem:[%s5258_s3 + $0x28] sm:$0xff]   ;;  %v3134_v58 = vld [vmem:[%s5258_s3 + $0x110] sm:$0xff]   ;;  %v3137_v61 = vld [vmem:[%s5258_s3 + $0x38] sm:$0xff]  }
  0xeb   :  { %v170_v3 = vpop.f32.mrf.mxu0  ;;  %v196_v7 = vpop.f32.mrf.mxu1  ;;  %v3140_v0 = vld [vmem:[%s5258_s3 + $0x128] sm:$0xff]  }
  0xec   :  { %804 = vmatprep.subr.bf16.mxu0 %v212_v62  ;;  %v218_v16 = vpack.c.bf16 %v196_v7, %v192_v60  ;;  %v3136_v60 = vld [vmem:[%s5258_s3 + $0x118] sm:$0xff]   ;;  %v3138_v62 = vld [vmem:[%s5258_s3 + $0x120] sm:$0xff]  }
  0xed   :  { %805 = vmatpush1.bf16.msra.mxu0 %v211_v1  ;;  %v172_v8 = vpop.f32.mrf.mxu0  ;;  %v3313_v10 = vpop.f32.mrf.mxu1  ;;  %v3141_v1 = vld [vmem:[%s5258_s3 + $0x48] sm:$0xff]  }
  0xee   :  { %1659 = vmatprep.subr.bf16.mxu0 %v216_v63  ;;  %v3139_v63 = vld [vmem:[%s5258_s3 + $0x40] sm:$0xff]  }
  0xef   :  { %v174_v11 = vpop.f32.mrf.mxu0  ;;  %v202_v12 = vpop.f32.mrf.mxu1 }
  0xf0   :  { %2815 = vmatmul.mubr.msk.bf16.gmra.mxu1 %vm97_vm0, %v3095_v5  ;;  %2870 = vmatmul.mubr.msk.bf16.vlgmr.msra.gmra.mxu0 %vm97_vm0, %v3096_v6  ;;  %v213_v13 = vpack.c.bf16 %v174_v11, %v170_v3  ;;  %v3142_v3 = vld [vmem:[%s5258_s3 + $0x130] sm:$0xff]   ;;  %v3144_v11 = vld [vmem:[%s5258_s3 + $0x138] sm:$0xff]  }
  0xf1   :  { %v176_v14 = vpop.f32.mrf.mxu0  ;;  %1660 = vmatpush1.bf16.msra.mxu0 %v215_v9  ;;  %413 = vmatprep.mubr.bf16.mxu1 %v3214_v2  ;;  %v3319_v17 = vpop.f32.mrf.mxu1  ;;  %v3143_v9 = vld [vmem:[%s5258_s3 + $0x50] sm:$0xff]  }
  0xf2   :  { %v214_v15 = vpack.c.bf16 %v176_v14, %v172_v8  ;;  %832 = vmatprep.mubr.bf16.mxu0 %v3214_v2  ;;  %v219_v18 = vpack.c.bf16 %v3319_v17, %v3313_v10 }
  0xf3   :  { %v206_v21 = vpop.f32.mrf.mxu1 }
  0xf4   :  { %1232 = vmatprep.subr.bf16.mxu1 %v214_v15  ;;  %v220_v22 = vpack.c.bf16 %v206_v21, %v202_v12 }
  0xf5   :  { %1233 = vmatpush1.bf16.msra.mxu1 %v213_v13  ;;  %v3577_v13 = vstv %s2884_s30 }
  0xf6   :  { %2086 = vmatprep.subr.bf16.mxu1 %v218_v16  ;;  %2513 = vmatprep.subr.bf16.mxu0 %v220_v22 }
  0xf8   :  { %2816 = vmatmul.mubr.msk.bf16.gmra.mxu1 %vm97_vm0, %v3097_v19  ;;  %2871 = vmatmul.mubr.msk.bf16.gmra.mxu0 %vm97_vm0, %v3098_v20 }
  0xf9   :  { %423 = vmatprep.mubr.bf16.mxu1 %v3214_v2  ;;  %842 = vmatprep.mubr.bf16.mxu0 %v3214_v2 }
 0x100   :  { %2817 = vmatmul.mubr.msk.bf16.gmra.mxu1 %vm97_vm0, %v3099_v23  ;;  %2872 = vmatmul.mubr.msk.bf16.gmra.mxu0 %vm97_vm0, %v3100_v24 }
 0x101   :  { %433 = vmatprep.mubr.bf16.mxu1 %v3214_v2  ;;  %852 = vmatprep.mubr.bf16.mxu0 %v3214_v2 }
 0x108   :  { %2818 = vmatmul.mubr.msk.bf16.gmra.mxu1 %vm97_vm0, %v3101_v25  ;;  %2873 = vmatmul.mubr.msk.bf16.gmra.mxu0 %vm97_vm0, %v3102_v26  ;;  %v3145_v25 = vld [vmem:[%s5258_s3 + $0x58] sm:$0xff]  }
 0x109   :  { %443 = vmatprep.mubr.bf16.mxu1 %v3214_v2  ;;  %862 = vmatprep.mubr.bf16.mxu0 %v3214_v2 }
 0x110   :  { %2819 = vmatmul.mubr.msk.bf16.gmra.mxu1 %vm97_vm0, %v3103_v27  ;;  %2874 = vmatmul.mubr.msk.bf16.gmra.mxu0 %vm97_vm0, %v3104_v28  ;;  %v3146_v27 = vld [vmem:[%s5258_s3 + $0x140] sm:$0xff]  }
 0x111   :  { %453 = vmatprep.mubr.bf16.mxu1 %v3214_v2  ;;  %872 = vmatprep.mubr.bf16.mxu0 %v3214_v2 }
 0x118   :  { %2820 = vmatmul.mubr.msk.bf16.gmra.mxu1 %vm97_vm0, %v3105_v29  ;;  %2875 = vmatmul.mubr.msk.bf16.gmra.mxu0 %vm97_vm0, %v3106_v30 }
 0x119   :  { %463 = vmatprep.mubr.bf16.mxu1 %v3214_v2  ;;  %882 = vmatprep.mubr.bf16.mxu0 %v3214_v2 }
 0x120   :  { %2821 = vmatmul.mubr.msk.bf16.gmra.mxu1 %vm97_vm0, %v3107_v31  ;;  %2876 = vmatmul.mubr.msk.bf16.gmra.mxu0 %vm97_vm0, %v3108_v32 }
 0x121   :  { %473 = vmatprep.mubr.bf16.mxu1 %v3214_v2  ;;  %892 = vmatprep.mubr.bf16.mxu0 %v3214_v2 }
 0x128   :  { %2822 = vmatmul.mubr.msk.bf16.gmra.mxu1 %vm97_vm0, %v3109_v33  ;;  %2877 = vmatmul.mubr.msk.bf16.gmra.mxu0 %vm97_vm0, %v3110_v34 }
 0x129   :  { %483 = vmatprep.mubr.bf16.mxu1 %v3214_v2  ;;  %902 = vmatprep.mubr.bf16.mxu0 %v3214_v2 }
 0x130   :  { %2823 = vmatmul.mubr.msk.bf16.gmra.mxu1 %vm97_vm0, %v3111_v35  ;;  %2878 = vmatmul.mubr.msk.bf16.gmra.mxu0 %vm97_vm0, %v3112_v36 }
 0x131   :  { %493 = vmatprep.mubr.bf16.mxu1 %v3214_v2  ;;  %912 = vmatprep.mubr.bf16.mxu0 %v3214_v2 }
 0x138   :  { %2824 = vmatmul.mubr.msk.bf16.gmra.mxu1 %vm97_vm0, %v3113_v37  ;;  %2879 = vmatmul.mubr.msk.bf16.gmra.mxu0 %vm97_vm0, %v3114_v38 }
 0x139   :  { %503 = vmatprep.mubr.bf16.mxu1 %v3214_v2  ;;  %922 = vmatprep.mubr.bf16.mxu0 %v3214_v2 }
 0x140   :  { %2825 = vmatmul.mubr.msk.bf16.gmra.mxu1 %vm97_vm0, %v3115_v39  ;;  %2880 = vmatmul.mubr.msk.bf16.gmra.mxu0 %vm97_vm0, %v3116_v40 }
 0x141   :  { %513 = vmatprep.mubr.bf16.mxu1 %v3214_v2  ;;  %932 = vmatprep.mubr.bf16.mxu0 %v3214_v2 }
 0x148   :  { %2826 = vmatmul.mubr.msk.bf16.gmra.mxu1 %vm97_vm0, %v3117_v41  ;;  %2881 = vmatmul.mubr.msk.bf16.gmra.mxu0 %vm97_vm0, %v3118_v42 }
 0x149   :  { %523 = vmatprep.mubr.bf16.mxu1 %v3214_v2  ;;  %942 = vmatprep.mubr.bf16.mxu0 %v3214_v2 }
 0x150   :  { %2827 = vmatmul.mubr.msk.bf16.gmra.mxu1 %vm97_vm0, %v3119_v43  ;;  %2882 = vmatmul.mubr.msk.bf16.gmra.mxu0 %vm97_vm0, %v3120_v44  ;;  %v3147_v43 = vld [vmem:[%s5258_s3 + $0x60] sm:$0xff]  }
 0x151   :  { %952 = vmatprep.mubr.bf16.mxu0 %v3214_v2  ;;  %1250 = vmatprep.mubr.bf16.mxu1 %v3214_v2 }
 0x158   :  { %2883 = vmatmul.mubr.msk.bf16.gmra.mxu0 %vm97_vm0, %v3121_v45  ;;  %2927 = vmatmul.mubr.msk.bf16.vlgmr.msra.gmra.mxu1 %vm97_vm0, %v3122_v46  ;;  %v3148_v45 = vld [vmem:[%s5258_s3 + $0x148] sm:$0xff]  }
 0x159   :  { %2087 = vmatpush1.bf16.msra.mxu1 %v217_v4  ;;  %1677 = vmatprep.mubr.bf16.mxu0 %v3214_v2  ;;  %v3555_v4 = vstv %s534_s26 }
 0x15a   :  { %1260 = vmatprep.mubr.bf16.mxu1 %v3214_v2 }
 0x160   :  { %2956 = vmatmul.mubr.msk.bf16.vlgmr.msra.gmra.mxu0 %vm97_vm0, %v3123_v47  ;;  %2928 = vmatmul.mubr.msk.bf16.gmra.mxu1 %vm97_vm0, %v3124_v48 }
 0x161   :  { %2514 = vmatpush1.bf16.msra.mxu0 %v219_v18  ;;  %1687 = vmatprep.mubr.bf16.mxu0 %v3214_v2 }
 0x162   :  { %1270 = vmatprep.mubr.bf16.mxu1 %v3214_v2 }
 0x168   :  { %2957 = vmatmul.mubr.msk.bf16.gmra.mxu0 %vm97_vm0, %v3125_v49  ;;  %2929 = vmatmul.mubr.msk.bf16.gmra.mxu1 %vm97_vm0, %v3126_v50 }
 0x169   :  { %1697 = vmatprep.mubr.bf16.mxu0 %v3214_v2  ;;  %1280 = vmatprep.mubr.bf16.mxu1 %v3214_v2 }
 0x170   :  { %2958 = vmatmul.mubr.msk.bf16.gmra.mxu0 %vm97_vm0, %v3127_v51  ;;  %2930 = vmatmul.mubr.msk.bf16.gmra.mxu1 %vm97_vm0, %v3128_v52 }
 0x171   :  { %1707 = vmatprep.mubr.bf16.mxu0 %v3214_v2  ;;  %1290 = vmatprep.mubr.bf16.mxu1 %v3214_v2 }
 0x178   :  { %2959 = vmatmul.mubr.msk.bf16.gmra.mxu0 %vm97_vm0, %v3129_v53  ;;  %2931 = vmatmul.mubr.msk.bf16.gmra.mxu1 %vm97_vm0, %v3130_v54 }
 0x179   :  { %1717 = vmatprep.mubr.bf16.mxu0 %v3214_v2  ;;  %1300 = vmatprep.mubr.bf16.mxu1 %v3214_v2 }
 0x180   :  { %2960 = vmatmul.mubr.msk.bf16.gmra.mxu0 %vm97_vm0, %v3131_v55  ;;  %2932 = vmatmul.mubr.msk.bf16.gmra.mxu1 %vm97_vm0, %v3132_v56 }
 0x181   :  { %1727 = vmatprep.mubr.bf16.mxu0 %v3214_v2  ;;  %1310 = vmatprep.mubr.bf16.mxu1 %v3214_v2 }
 0x188   :  { %2961 = vmatmul.mubr.msk.bf16.gmra.mxu0 %vm97_vm0, %v3133_v57  ;;  %2933 = vmatmul.mubr.msk.bf16.gmra.mxu1 %vm97_vm0, %v3134_v58 }
 0x189   :  { %1737 = vmatprep.mubr.bf16.mxu0 %v3214_v2  ;;  %1320 = vmatprep.mubr.bf16.mxu1 %v3214_v2 }
 0x190   :  { %2962 = vmatmul.mubr.msk.bf16.gmra.mxu0 %vm97_vm0, %v3135_v59  ;;  %2934 = vmatmul.mubr.msk.bf16.gmra.mxu1 %vm97_vm0, %v3136_v60 }
 0x191   :  { %1747 = vmatprep.mubr.bf16.mxu0 %v3214_v2  ;;  %1330 = vmatprep.mubr.bf16.mxu1 %v3214_v2 }
 0x198   :  { %2963 = vmatmul.mubr.msk.bf16.gmra.mxu0 %vm97_vm0, %v3137_v61  ;;  %2935 = vmatmul.mubr.msk.bf16.gmra.mxu1 %vm97_vm0, %v3138_v62  ;;  %v3149_v61 = vld [vmem:[%s5258_s3 + $0x68] sm:$0xff]  }
 0x199   :  { %1757 = vmatprep.mubr.bf16.mxu0 %v3214_v2  ;;  %1340 = vmatprep.mubr.bf16.mxu1 %v3214_v2 }
 0x1a0   :  { %2964 = vmatmul.mubr.msk.bf16.gmra.mxu0 %vm97_vm0, %v3139_v63  ;;  %2936 = vmatmul.mubr.msk.bf16.gmra.mxu1 %vm97_vm0, %v3140_v0  ;;  %v3150_v63 = vld [vmem:[%s5258_s3 + $0x70] sm:$0xff]  }
 0x1a1   :  { %1767 = vmatprep.mubr.bf16.mxu0 %v3214_v2  ;;  %1350 = vmatprep.mubr.bf16.mxu1 %v3214_v2 }
 0x1a8   :  { %2965 = vmatmul.mubr.msk.bf16.gmra.mxu0 %vm97_vm0, %v3141_v1  ;;  %v395_v5 = vpop.f32.mrf.mxu1  ;;  %2937 = vmatmul.mubr.msk.bf16.gmra.mxu1 %vm97_vm0, %v3142_v3 }
 0x1a9   :  { %1777 = vmatprep.mubr.bf16.mxu0 %v3214_v2  ;;  %v536_v6 = vsub.f32 %v395_v5, %v3555_v4  ;;  %1360 = vmatprep.mubr.bf16.mxu1 %v3214_v2 }
 0x1aa   :  { %v397_v7 = vpop.f32.mrf.mxu1 }
 0x1ab   :  { %592 = vst [vmem:[%s5259_s4] sm:$0xff] %v536_v6  ;;  %v537_v8 = vsub.f32 %v397_v7, %v3555_v4 }
 0x1ac   :  { %v399_v10 = vpop.f32.mrf.mxu1 }
 0x1ad   :  { %594 = vst.msk [vmem:[%s5259_s4 + $0x8] sm:$0xff] %vm593_vm1, %v537_v8  ;;  %v538_v12 = vsub.f32 %v399_v10, %v3555_v4 }
 0x1ae   :  { %v401_v14 = vpop.f32.mrf.mxu1 }
 0x1af   :  { %595 = vst [vmem:[%s5259_s4 + $0x10] sm:$0xff] %v538_v12  ;;  %v539_v15 = vsub.f32 %v401_v14, %v3555_v4 }
 0x1b0   :  { %v824_v16 = vpop.f32.mrf.mxu0  ;;  %2966 = vmatmul.mubr.msk.bf16.gmra.mxu0 %vm97_vm0, %v3143_v9  ;;  %v405_v17 = vpop.f32.mrf.mxu1  ;;  %2938 = vmatmul.mubr.msk.bf16.gmra.mxu1 %vm97_vm0, %v3144_v11 }
 0x1b1   :  { %v965_v18 = vsub.f32 %v824_v16, %v3577_v13  ;;  %596 = vst.msk [vmem:[%s5259_s4 + $0x18] sm:$0xff] %vm593_vm1, %v539_v15  ;;  %1787 = vmatprep.mubr.bf16.mxu0 %v3214_v2  ;;  %v540_v19 = vsub.f32 %v405_v17, %v3555_v4  ;;  %1370 = vmatprep.mubr.bf16.mxu1 %v3214_v2 }
 0x1b2   :  { %v826_v20 = vpop.f32.mrf.mxu0  ;;  %v407_v21 = vpop.f32.mrf.mxu1 }
 0x1b3   :  { %1021 = vst [vmem:[%s5259_s4 + $0x1c0] sm:$0xff] %v965_v18  ;;  %v966_v22 = vsub.f32 %v826_v20, %v3577_v13  ;;  %597 = vst [vmem:[%s5259_s4 + $0x20] sm:$0xff] %v540_v19  ;;  %v541_v23 = vsub.f32 %v407_v21, %v3555_v4  ;;  %v3151_v18 = vld [vmem:[%s5258_s3 + $0xe0] sm:$0xff]   ;;  %v3152_v20 = vld [vmem:[%s5258_s3 + $0x78] sm:$0xff]  }
 0x1b4   :  { %v828_v24 = vpop.f32.mrf.mxu0  ;;  %v409_v26 = vpop.f32.mrf.mxu1 }
 0x1b5   :  { %1022 = vst.msk [vmem:[%s5259_s4 + $0x1c8] sm:$0xff] %vm593_vm1, %v966_v22  ;;  %v967_v28 = vsub.f32 %v828_v24, %v3577_v13  ;;  %598 = vst.msk [vmem:[%s5259_s4 + $0x28] sm:$0xff] %vm593_vm1, %v541_v23  ;;  %v542_v29 = vsub.f32 %v409_v26, %v3555_v4 }
 0x1b6   :  { %v830_v30 = vpop.f32.mrf.mxu0  ;;  %v411_v31 = vpop.f32.mrf.mxu1 }
 0x1b7   :  { %1023 = vst [vmem:[%s5259_s4 + $0x1d0] sm:$0xff] %v967_v28  ;;  %v968_v32 = vsub.f32 %v830_v30, %v3577_v13  ;;  %599 = vst [vmem:[%s5259_s4 + $0x30] sm:$0xff] %v542_v29  ;;  %v543_v33 = vsub.f32 %v411_v31, %v3555_v4 }
 0x1b8   :  { %v834_v34 = vpop.f32.mrf.mxu0  ;;  %2967 = vmatmul.mubr.msk.bf16.gmra.mxu0 %vm97_vm0, %v3145_v25  ;;  %v415_v35 = vpop.f32.mrf.mxu1  ;;  %2939 = vmatmul.mubr.msk.bf16.gmra.mxu1 %vm97_vm0, %v3146_v27 }
 0x1b9   :  { %1024 = vst.msk [vmem:[%s5259_s4 + $0x1d8] sm:$0xff] %vm593_vm1, %v968_v32  ;;  %v969_v36 = vsub.f32 %v834_v34, %v3577_v13  ;;  %600 = vst.msk [vmem:[%s5259_s4 + $0x38] sm:$0xff] %vm593_vm1, %v543_v33  ;;  %1797 = vmatprep.mubr.bf16.mxu0 %v3214_v2  ;;  %v544_v37 = vsub.f32 %v415_v35, %v3555_v4  ;;  %1380 = vmatprep.mubr.bf16.mxu1 %v3214_v2 }
 0x1ba   :  { %v836_v38 = vpop.f32.mrf.mxu0  ;;  %v417_v39 = vpop.f32.mrf.mxu1 }
 0x1bb   :  { %1025 = vst [vmem:[%s5259_s4 + $0x1e0] sm:$0xff] %v969_v36  ;;  %v970_v40 = vsub.f32 %v836_v38, %v3577_v13  ;;  %601 = vst [vmem:[%s5259_s4 + $0x40] sm:$0xff] %v544_v37  ;;  %v545_v41 = vsub.f32 %v417_v39, %v3555_v4  ;;  %v3153_v36 = vld [vmem:[%s5258_s3 + $0xe8] sm:$0xff]   ;;  %v3154_v38 = vld [vmem:[%s5258_s3 + $0x80] sm:$0xff]  }
 0x1bc   :  { %v838_v42 = vpop.f32.mrf.mxu0  ;;  %v419_v44 = vpop.f32.mrf.mxu1 }
 0x1bd   :  { %1026 = vst.msk [vmem:[%s5259_s4 + $0x1e8] sm:$0xff] %vm593_vm1, %v970_v40  ;;  %v971_v46 = vsub.f32 %v838_v42, %v3577_v13  ;;  %602 = vst.msk [vmem:[%s5259_s4 + $0x48] sm:$0xff] %vm593_vm1, %v545_v41  ;;  %v546_v47 = vsub.f32 %v419_v44, %v3555_v4 }
 0x1be   :  { %v840_v48 = vpop.f32.mrf.mxu0  ;;  %v421_v49 = vpop.f32.mrf.mxu1 }
 0x1bf   :  { %1027 = vst [vmem:[%s5259_s4 + $0x1f0] sm:$0xff] %v971_v46  ;;  %v972_v50 = vsub.f32 %v840_v48, %v3577_v13  ;;  %603 = vst [vmem:[%s5259_s4 + $0x50] sm:$0xff] %v546_v47  ;;  %v547_v51 = vsub.f32 %v421_v49, %v3555_v4 }
 0x1c0   :  { %v844_v52 = vpop.f32.mrf.mxu0  ;;  %2968 = vmatmul.mubr.msk.bf16.gmra.mxu0 %vm97_vm0, %v3147_v43  ;;  %v425_v53 = vpop.f32.mrf.mxu1  ;;  %2940 = vmatmul.mubr.msk.bf16.gmra.mxu1 %vm97_vm0, %v3148_v45 }
 0x1c1   :  { %1028 = vst.msk [vmem:[%s5259_s4 + $0x1f8] sm:$0xff] %vm593_vm1, %v972_v50  ;;  %v973_v54 = vsub.f32 %v844_v52, %v3577_v13  ;;  %604 = vst.msk [vmem:[%s5259_s4 + $0x58] sm:$0xff] %vm593_vm1, %v547_v51  ;;  %1807 = vmatprep.mubr.bf16.mxu0 %v3214_v2  ;;  %v548_v55 = vsub.f32 %v425_v53, %v3555_v4  ;;  %2104 = vmatprep.mubr.bf16.mxu1 %v3214_v2 }
 0x1c2   :  { %v846_v56 = vpop.f32.mrf.mxu0  ;;  %v427_v57 = vpop.f32.mrf.mxu1 }
 0x1c3   :  { %1029 = vst [vmem:[%s5259_s4 + $0x200] sm:$0xff] %v973_v54  ;;  %v974_v58 = vsub.f32 %v846_v56, %v3577_v13  ;;  %605 = vst [vmem:[%s5259_s4 + $0x60] sm:$0xff] %v548_v55  ;;  %v549_v59 = vsub.f32 %v427_v57, %v3555_v4  ;;  %v3155_v54 = vld [vmem:[%s5258_s3 + $0xf0] sm:$0xff]   ;;  %v3156_v56 = vld [vmem:[%s5258_s3 + $0x88] sm:$0xff]  }
 0x1c4   :  { %v848_v60 = vpop.f32.mrf.mxu0  ;;  %v429_v62 = vpop.f32.mrf.mxu1 }
 0x1c5   :  { %1030 = vst.msk [vmem:[%s5259_s4 + $0x208] sm:$0xff] %vm593_vm1, %v974_v58  ;;  %v975_v0 = vsub.f32 %v848_v60, %v3577_v13  ;;  %606 = vst.msk [vmem:[%s5259_s4 + $0x68] sm:$0xff] %vm593_vm1, %v549_v59  ;;  %v550_v1 = vsub.f32 %v429_v62, %v3555_v4 }
 0x1c6   :  { %v850_v3 = vpop.f32.mrf.mxu0  ;;  %v431_v5 = vpop.f32.mrf.mxu1 }
 0x1c7   :  { %1031 = vst [vmem:[%s5259_s4 + $0x210] sm:$0xff] %v975_v0  ;;  %v976_v6 = vsub.f32 %v850_v3, %v3577_v13  ;;  %607 = vst [vmem:[%s5259_s4 + $0x70] sm:$0xff] %v550_v1  ;;  %v551_v7 = vsub.f32 %v431_v5, %v3555_v4 }
 0x1c8   :  { %v854_v8 = vpop.f32.mrf.mxu0  ;;  %2969 = vmatmul.mubr.msk.bf16.gmra.mxu0 %vm97_vm0, %v3149_v61  ;;  %v435_v9 = vpop.f32.mrf.mxu1  ;;  %3012 = vmatmul.mubr.msk.bf16.vlgmr.msra.gmra.mxu1 %vm97_vm0, %v3150_v63 }
 0x1c9   :  { %1032 = vst.msk [vmem:[%s5259_s4 + $0x218] sm:$0xff] %vm593_vm1, %v976_v6  ;;  %v977_v10 = vsub.f32 %v854_v8, %v3577_v13  ;;  %608 = vst.msk [vmem:[%s5259_s4 + $0x78] sm:$0xff] %vm593_vm1, %v551_v7  ;;  %2531 = vmatprep.mubr.bf16.mxu0 %v3214_v2  ;;  %v552_v11 = vsub.f32 %v435_v9, %v3555_v4  ;;  %2114 = vmatprep.mubr.bf16.mxu1 %v3214_v2 }
 0x1ca   :  { %v856_v12 = vpop.f32.mrf.mxu0  ;;  %v437_v14 = vpop.f32.mrf.mxu1 }
 0x1cb   :  { %1033 = vst [vmem:[%s5259_s4 + $0x220] sm:$0xff] %v977_v10  ;;  %v978_v15 = vsub.f32 %v856_v12, %v3577_v13  ;;  %609 = vst [vmem:[%s5259_s4 + $0x80] sm:$0xff] %v552_v11  ;;  %v553_v16 = vsub.f32 %v437_v14, %v3555_v4  ;;  %v3157_v10 = vld [vmem:[%s5258_s3 + $0xf8] sm:$0xff]   ;;  %v3158_v12 = vld [vmem:[%s5258_s3 + $0x90] sm:$0xff]  }
 0x1cc   :  { %v858_v17 = vpop.f32.mrf.mxu0  ;;  %v439_v19 = vpop.f32.mrf.mxu1 }
 0x1cd   :  { %1034 = vst.msk [vmem:[%s5259_s4 + $0x228] sm:$0xff] %vm593_vm1, %v978_v15  ;;  %v979_v21 = vsub.f32 %v858_v17, %v3577_v13  ;;  %610 = vst.msk [vmem:[%s5259_s4 + $0x88] sm:$0xff] %vm593_vm1, %v553_v16  ;;  %v554_v22 = vsub.f32 %v439_v19, %v3555_v4 }
 0x1ce   :  { %v860_v23 = vpop.f32.mrf.mxu0  ;;  %v441_v24 = vpop.f32.mrf.mxu1 }
 0x1cf   :  { %1035 = vst [vmem:[%s5259_s4 + $0x230] sm:$0xff] %v979_v21  ;;  %v980_v25 = vsub.f32 %v860_v23, %v3577_v13  ;;  %611 = vst [vmem:[%s5259_s4 + $0x90] sm:$0xff] %v554_v22  ;;  %v555_v26 = vsub.f32 %v441_v24, %v3555_v4 }
 0x1d0   :  { %v864_v27 = vpop.f32.mrf.mxu0  ;;  %3069 = vmatmul.mubr.msk.bf16.vlgmr.msra.gmra.mxu0 %vm97_vm0, %v3151_v18  ;;  %v445_v28 = vpop.f32.mrf.mxu1  ;;  %3013 = vmatmul.mubr.msk.bf16.gmra.mxu1 %vm97_vm0, %v3152_v20 }
 0x1d1   :  { %1036 = vst.msk [vmem:[%s5259_s4 + $0x238] sm:$0xff] %vm593_vm1, %v980_v25  ;;  %v981_v29 = vsub.f32 %v864_v27, %v3577_v13  ;;  %612 = vst.msk [vmem:[%s5259_s4 + $0x98] sm:$0xff] %vm593_vm1, %v555_v26  ;;  %2541 = vmatprep.mubr.bf16.mxu0 %v3214_v2  ;;  %v556_v30 = vsub.f32 %v445_v28, %v3555_v4  ;;  %2124 = vmatprep.mubr.bf16.mxu1 %v3214_v2 }
 0x1d2   :  { %v866_v31 = vpop.f32.mrf.mxu0  ;;  %v447_v32 = vpop.f32.mrf.mxu1 }
 0x1d3   :  { %1037 = vst [vmem:[%s5259_s4 + $0x240] sm:$0xff] %v981_v29  ;;  %v982_v33 = vsub.f32 %v866_v31, %v3577_v13  ;;  %613 = vst [vmem:[%s5259_s4 + $0xa0] sm:$0xff] %v556_v30  ;;  %v557_v34 = vsub.f32 %v447_v32, %v3555_v4  ;;  %v3159_v29 = vld [vmem:[%s5258_s3 + $0x100] sm:$0xff]   ;;  %v3160_v31 = vld [vmem:[%s5258_s3 + $0x98] sm:$0xff]  }
 0x1d4   :  { %v868_v35 = vpop.f32.mrf.mxu0  ;;  %v449_v37 = vpop.f32.mrf.mxu1 }
 0x1d5   :  { %1038 = vst.msk [vmem:[%s5259_s4 + $0x248] sm:$0xff] %vm593_vm1, %v982_v33  ;;  %v983_v39 = vsub.f32 %v868_v35, %v3577_v13  ;;  %614 = vst.msk [vmem:[%s5259_s4 + $0xa8] sm:$0xff] %vm593_vm1, %v557_v34  ;;  %v558_v40 = vsub.f32 %v449_v37, %v3555_v4 }
 0x1d6   :  { %v870_v41 = vpop.f32.mrf.mxu0  ;;  %v451_v42 = vpop.f32.mrf.mxu1 }
 0x1d7   :  { %1039 = vst [vmem:[%s5259_s4 + $0x250] sm:$0xff] %v983_v39  ;;  %v984_v43 = vsub.f32 %v870_v41, %v3577_v13  ;;  %615 = vst [vmem:[%s5259_s4 + $0xb0] sm:$0xff] %v558_v40  ;;  %v559_v44 = vsub.f32 %v451_v42, %v3555_v4 }
 0x1d8   :  { %v874_v45 = vpop.f32.mrf.mxu0  ;;  %3070 = vmatmul.mubr.msk.bf16.gmra.mxu0 %vm97_vm0, %v3153_v36  ;;  %v455_v46 = vpop.f32.mrf.mxu1  ;;  %3014 = vmatmul.mubr.msk.bf16.gmra.mxu1 %vm97_vm0, %v3154_v38 }
 0x1d9   :  { %1040 = vst.msk [vmem:[%s5259_s4 + $0x258] sm:$0xff] %vm593_vm1, %v984_v43  ;;  %v985_v47 = vsub.f32 %v874_v45, %v3577_v13  ;;  %616 = vst.msk [vmem:[%s5259_s4 + $0xb8] sm:$0xff] %vm593_vm1, %v559_v44  ;;  %2551 = vmatprep.mubr.bf16.mxu0 %v3214_v2  ;;  %v560_v48 = vsub.f32 %v455_v46, %v3555_v4  ;;  %2134 = vmatprep.mubr.bf16.mxu1 %v3214_v2 }
 0x1da   :  { %v876_v49 = vpop.f32.mrf.mxu0  ;;  %v457_v50 = vpop.f32.mrf.mxu1 }
 0x1db   :  { %1041 = vst [vmem:[%s5259_s4 + $0x260] sm:$0xff] %v985_v47  ;;  %v986_v51 = vsub.f32 %v876_v49, %v3577_v13  ;;  %617 = vst [vmem:[%s5259_s4 + $0xc0] sm:$0xff] %v560_v48  ;;  %v561_v52 = vsub.f32 %v457_v50, %v3555_v4  ;;  %v3161_v47 = vld [vmem:[%s5258_s3 + $0x108] sm:$0xff]   ;;  %v3162_v49 = vld [vmem:[%s5258_s3 + $0xa0] sm:$0xff]  }
 0x1dc   :  { %v878_v53 = vpop.f32.mrf.mxu0  ;;  %v459_v55 = vpop.f32.mrf.mxu1 }
 0x1dd   :  { %1042 = vst.msk [vmem:[%s5259_s4 + $0x268] sm:$0xff] %vm593_vm1, %v986_v51  ;;  %v987_v57 = vsub.f32 %v878_v53, %v3577_v13  ;;  %618 = vst.msk [vmem:[%s5259_s4 + $0xc8] sm:$0xff] %vm593_vm1, %v561_v52  ;;  %v562_v58 = vsub.f32 %v459_v55, %v3555_v4 }
 0x1de   :  { %v880_v59 = vpop.f32.mrf.mxu0  ;;  %v461_v60 = vpop.f32.mrf.mxu1 }
 0x1df   :  { %1043 = vst [vmem:[%s5259_s4 + $0x270] sm:$0xff] %v987_v57  ;;  %v988_v61 = vsub.f32 %v880_v59, %v3577_v13  ;;  %619 = vst [vmem:[%s5259_s4 + $0xd0] sm:$0xff] %v562_v58  ;;  %v563_v62 = vsub.f32 %v461_v60, %v3555_v4 }
 0x1e0   :  { %v884_v63 = vpop.f32.mrf.mxu0  ;;  %3071 = vmatmul.mubr.msk.bf16.gmra.mxu0 %vm97_vm0, %v3155_v54  ;;  %v465_v0 = vpop.f32.mrf.mxu1  ;;  %3015 = vmatmul.mubr.msk.bf16.gmra.mxu1 %vm97_vm0, %v3156_v56 }
 0x1e1   :  { %1044 = vst.msk [vmem:[%s5259_s4 + $0x278] sm:$0xff] %vm593_vm1, %v988_v61  ;;  %v989_v1 = vsub.f32 %v884_v63, %v3577_v13  ;;  %620 = vst.msk [vmem:[%s5259_s4 + $0xd8] sm:$0xff] %vm593_vm1, %v563_v62  ;;  %2561 = vmatprep.mubr.bf16.mxu0 %v3214_v2  ;;  %v564_v3 = vsub.f32 %v465_v0, %v3555_v4  ;;  %2144 = vmatprep.mubr.bf16.mxu1 %v3214_v2 }
 0x1e2   :  { %v886_v5 = vpop.f32.mrf.mxu0  ;;  %v467_v6 = vpop.f32.mrf.mxu1 }
 0x1e3   :  { %1045 = vst [vmem:[%s5259_s4 + $0x280] sm:$0xff] %v989_v1  ;;  %v990_v7 = vsub.f32 %v886_v5, %v3577_v13  ;;  %621 = vst [vmem:[%s5259_s4 + $0xe0] sm:$0xff] %v564_v3  ;;  %v565_v8 = vsub.f32 %v467_v6, %v3555_v4  ;;  %v3163_v1 = vld [vmem:[%s5258_s3 + $0x110] sm:$0xff]   ;;  %v3164_v5 = vld [vmem:[%s5258_s3 + $0xa8] sm:$0xff]  }
 0x1e4   :  { %v888_v9 = vpop.f32.mrf.mxu0  ;;  %v469_v11 = vpop.f32.mrf.mxu1 }
 0x1e5   :  { %1046 = vst.msk [vmem:[%s5259_s4 + $0x288] sm:$0xff] %vm593_vm1, %v990_v7  ;;  %v991_v14 = vsub.f32 %v888_v9, %v3577_v13  ;;  %622 = vst.msk [vmem:[%s5259_s4 + $0xe8] sm:$0xff] %vm593_vm1, %v565_v8  ;;  %v566_v15 = vsub.f32 %v469_v11, %v3555_v4 }
 0x1e6   :  { %v890_v16 = vpop.f32.mrf.mxu0  ;;  %v471_v17 = vpop.f32.mrf.mxu1 }
 0x1e7   :  { %1047 = vst [vmem:[%s5259_s4 + $0x290] sm:$0xff] %v991_v14  ;;  %v992_v18 = vsub.f32 %v890_v16, %v3577_v13  ;;  %623 = vst [vmem:[%s5259_s4 + $0xf0] sm:$0xff] %v566_v15  ;;  %v567_v19 = vsub.f32 %v471_v17, %v3555_v4 }
 0x1e8   :  { %v894_v20 = vpop.f32.mrf.mxu0  ;;  %3072 = vmatmul.mubr.msk.bf16.gmra.mxu0 %vm97_vm0, %v3157_v10  ;;  %v475_v21 = vpop.f32.mrf.mxu1  ;;  %3016 = vmatmul.mubr.msk.bf16.gmra.mxu1 %vm97_vm0, %v3158_v12 }
 0x1e9   :  { %1048 = vst.msk [vmem:[%s5259_s4 + $0x298] sm:$0xff] %vm593_vm1, %v992_v18  ;;  %v993_v22 = vsub.f32 %v894_v20, %v3577_v13  ;;  %624 = vst.msk [vmem:[%s5259_s4 + $0xf8] sm:$0xff] %vm593_vm1, %v567_v19  ;;  %2571 = vmatprep.mubr.bf16.mxu0 %v3214_v2  ;;  %v568_v23 = vsub.f32 %v475_v21, %v3555_v4  ;;  %2154 = vmatprep.mubr.bf16.mxu1 %v3214_v2 }
 0x1ea   :  { %v896_v24 = vpop.f32.mrf.mxu0  ;;  %v477_v25 = vpop.f32.mrf.mxu1 }
 0x1eb   :  { %1049 = vst [vmem:[%s5259_s4 + $0x2a0] sm:$0xff] %v993_v22  ;;  %v994_v26 = vsub.f32 %v896_v24, %v3577_v13  ;;  %625 = vst [vmem:[%s5259_s4 + $0x100] sm:$0xff] %v568_v23  ;;  %v569_v27 = vsub.f32 %v477_v25, %v3555_v4  ;;  %v3165_v22 = vld [vmem:[%s5258_s3 + $0x118] sm:$0xff]   ;;  %v3166_v24 = vld [vmem:[%s5258_s3 + $0xb0] sm:$0xff]  }
 0x1ec   :  { %v898_v28 = vpop.f32.mrf.mxu0  ;;  %v479_v30 = vpop.f32.mrf.mxu1 }
 0x1ed   :  { %1050 = vst.msk [vmem:[%s5259_s4 + $0x2a8] sm:$0xff] %vm593_vm1, %v994_v26  ;;  %v995_v32 = vsub.f32 %v898_v28, %v3577_v13  ;;  %626 = vst.msk [vmem:[%s5259_s4 + $0x108] sm:$0xff] %vm593_vm1, %v569_v27  ;;  %v570_v33 = vsub.f32 %v479_v30, %v3555_v4 }
 0x1ee   :  { %v900_v34 = vpop.f32.mrf.mxu0  ;;  %v481_v35 = vpop.f32.mrf.mxu1 }
 0x1ef   :  { %1051 = vst [vmem:[%s5259_s4 + $0x2b0] sm:$0xff] %v995_v32  ;;  %v996_v36 = vsub.f32 %v900_v34, %v3577_v13  ;;  %627 = vst [vmem:[%s5259_s4 + $0x110] sm:$0xff] %v570_v33  ;;  %v571_v37 = vsub.f32 %v481_v35, %v3555_v4 }
 0x1f0   :  { %v904_v38 = vpop.f32.mrf.mxu0  ;;  %3073 = vmatmul.mubr.msk.bf16.gmra.mxu0 %vm97_vm0, %v3159_v29  ;;  %v485_v39 = vpop.f32.mrf.mxu1  ;;  %3017 = vmatmul.mubr.msk.bf16.gmra.mxu1 %vm97_vm0, %v3160_v31 }
 0x1f1   :  { %1052 = vst.msk [vmem:[%s5259_s4 + $0x2b8] sm:$0xff] %vm593_vm1, %v996_v36  ;;  %v997_v40 = vsub.f32 %v904_v38, %v3577_v13  ;;  %628 = vst.msk [vmem:[%s5259_s4 + $0x118] sm:$0xff] %vm593_vm1, %v571_v37  ;;  %2581 = vmatprep.mubr.bf16.mxu0 %v3214_v2  ;;  %v572_v41 = vsub.f32 %v485_v39, %v3555_v4  ;;  %2164 = vmatprep.mubr.bf16.mxu1 %v3214_v2 }
 0x1f2   :  { %v906_v42 = vpop.f32.mrf.mxu0  ;;  %v487_v43 = vpop.f32.mrf.mxu1 }
 0x1f3   :  { %1053 = vst [vmem:[%s5259_s4 + $0x2c0] sm:$0xff] %v997_v40  ;;  %v998_v44 = vsub.f32 %v906_v42, %v3577_v13  ;;  %629 = vst [vmem:[%s5259_s4 + $0x120] sm:$0xff] %v572_v41  ;;  %v573_v45 = vsub.f32 %v487_v43, %v3555_v4  ;;  %v3167_v40 = vld [vmem:[%s5258_s3 + $0x120] sm:$0xff]   ;;  %v3168_v42 = vld [vmem:[%s5258_s3 + $0xb8] sm:$0xff]  }
 0x1f4   :  { %v908_v46 = vpop.f32.mrf.mxu0  ;;  %v489_v48 = vpop.f32.mrf.mxu1 }
 0x1f5   :  { %1054 = vst.msk [vmem:[%s5259_s4 + $0x2c8] sm:$0xff] %vm593_vm1, %v998_v44  ;;  %v999_v50 = vsub.f32 %v908_v46, %v3577_v13  ;;  %630 = vst.msk [vmem:[%s5259_s4 + $0x128] sm:$0xff] %vm593_vm1, %v573_v45  ;;  %v574_v51 = vsub.f32 %v489_v48, %v3555_v4 }
 0x1f6   :  { %v910_v52 = vpop.f32.mrf.mxu0  ;;  %v491_v53 = vpop.f32.mrf.mxu1 }
 0x1f7   :  { %1055 = vst [vmem:[%s5259_s4 + $0x2d0] sm:$0xff] %v999_v50  ;;  %v1000_v54 = vsub.f32 %v910_v52, %v3577_v13  ;;  %631 = vst [vmem:[%s5259_s4 + $0x130] sm:$0xff] %v574_v51  ;;  %v575_v55 = vsub.f32 %v491_v53, %v3555_v4 }
 0x1f8   :  { %v914_v56 = vpop.f32.mrf.mxu0  ;;  %3074 = vmatmul.mubr.msk.bf16.gmra.mxu0 %vm97_vm0, %v3161_v47  ;;  %v495_v57 = vpop.f32.mrf.mxu1  ;;  %3018 = vmatmul.mubr.msk.bf16.gmra.mxu1 %vm97_vm0, %v3162_v49 }
 0x1f9   :  { %1056 = vst.msk [vmem:[%s5259_s4 + $0x2d8] sm:$0xff] %vm593_vm1, %v1000_v54  ;;  %v1001_v58 = vsub.f32 %v914_v56, %v3577_v13  ;;  %632 = vst.msk [vmem:[%s5259_s4 + $0x138] sm:$0xff] %vm593_vm1, %v575_v55  ;;  %2591 = vmatprep.mubr.bf16.mxu0 %v3214_v2  ;;  %v576_v59 = vsub.f32 %v495_v57, %v3555_v4  ;;  %2174 = vmatprep.mubr.bf16.mxu1 %v3214_v2 }
 0x1fa   :  { %v916_v60 = vpop.f32.mrf.mxu0  ;;  %v497_v61 = vpop.f32.mrf.mxu1 }
 0x1fb   :  { %1057 = vst [vmem:[%s5259_s4 + $0x2e0] sm:$0xff] %v1001_v58  ;;  %v1002_v62 = vsub.f32 %v916_v60, %v3577_v13  ;;  %633 = vst [vmem:[%s5259_s4 + $0x140] sm:$0xff] %v576_v59  ;;  %v577_v63 = vsub.f32 %v497_v61, %v3555_v4  ;;  %v3169_v58 = vld [vmem:[%s5258_s3 + $0x128] sm:$0xff]   ;;  %v3170_v60 = vld [vmem:[%s5258_s3 + $0xc0] sm:$0xff]  }
 0x1fc   :  { %v918_v0 = vpop.f32.mrf.mxu0  ;;  %v499_v3 = vpop.f32.mrf.mxu1 }
 0x1fd   :  { %1058 = vst.msk [vmem:[%s5259_s4 + $0x2e8] sm:$0xff] %vm593_vm1, %v1002_v62  ;;  %v1003_v6 = vsub.f32 %v918_v0, %v3577_v13  ;;  %634 = vst.msk [vmem:[%s5259_s4 + $0x148] sm:$0xff] %vm593_vm1, %v577_v63  ;;  %v578_v7 = vsub.f32 %v499_v3, %v3555_v4 }
 0x1fe   :  { %v920_v8 = vpop.f32.mrf.mxu0  ;;  %v501_v9 = vpop.f32.mrf.mxu1 }
 0x1ff   :  { %1059 = vst [vmem:[%s5259_s4 + $0x2f0] sm:$0xff] %v1003_v6  ;;  %v1004_v10 = vsub.f32 %v920_v8, %v3577_v13  ;;  %635 = vst [vmem:[%s5259_s4 + $0x150] sm:$0xff] %v578_v7  ;;  %v579_v11 = vsub.f32 %v501_v9, %v3555_v4 }
 0x200   :  { %v924_v12 = vpop.f32.mrf.mxu0  ;;  %3075 = vmatmul.mubr.msk.bf16.gmra.mxu0 %vm97_vm0, %v3163_v1  ;;  %v505_v14 = vpop.f32.mrf.mxu1  ;;  %3019 = vmatmul.mubr.msk.bf16.gmra.mxu1 %vm97_vm0, %v3164_v5  ;;  %v4172_v1 = vstv %s4123_s17 }
 0x201   :  { %1060 = vst.msk [vmem:[%s5259_s4 + $0x2f8] sm:$0xff] %vm593_vm1, %v1004_v10  ;;  %v1005_v15 = vsub.f32 %v924_v12, %v3577_v13  ;;  %636 = vst.msk [vmem:[%s5259_s4 + $0x158] sm:$0xff] %vm593_vm1, %v579_v11  ;;  %2601 = vmatprep.mubr.bf16.mxu0 %v3214_v2  ;;  %v580_v16 = vsub.f32 %v505_v14, %v3555_v4  ;;  %2184 = vmatprep.mubr.bf16.mxu1 %v3214_v2 }
 0x202   :  { %v926_v17 = vpop.f32.mrf.mxu0  ;;  %v507_v18 = vpop.f32.mrf.mxu1 }
 0x203   :  { %1061 = vst [vmem:[%s5259_s4 + $0x300] sm:$0xff] %v1005_v15  ;;  %v1006_v19 = vsub.f32 %v926_v17, %v3577_v13  ;;  %637 = vst [vmem:[%s5259_s4 + $0x160] sm:$0xff] %v580_v16  ;;  %v581_v20 = vsub.f32 %v507_v18, %v3555_v4  ;;  %v3171_v16 = vld [vmem:[%s5258_s3 + $0x130] sm:$0xff]   ;;  %v3172_v18 = vld [vmem:[%s5258_s3 + $0xc8] sm:$0xff]  }
 0x204   :  { %v928_v21 = vpop.f32.mrf.mxu0  ;;  %v509_v23 = vpop.f32.mrf.mxu1 }
 0x205   :  { %1062 = vst.msk [vmem:[%s5259_s4 + $0x308] sm:$0xff] %vm593_vm1, %v1006_v19  ;;  %v1007_v25 = vsub.f32 %v928_v21, %v3577_v13  ;;  %638 = vst.msk [vmem:[%s5259_s4 + $0x168] sm:$0xff] %vm593_vm1, %v581_v20  ;;  %v582_v26 = vsub.f32 %v509_v23, %v3555_v4 }
 0x206   :  { %v930_v27 = vpop.f32.mrf.mxu0  ;;  %v511_v28 = vpop.f32.mrf.mxu1 }
 0x207   :  { %1063 = vst [vmem:[%s5259_s4 + $0x310] sm:$0xff] %v1007_v25  ;;  %v1008_v29 = vsub.f32 %v930_v27, %v3577_v13  ;;  %639 = vst [vmem:[%s5259_s4 + $0x170] sm:$0xff] %v582_v26  ;;  %v583_v30 = vsub.f32 %v511_v28, %v3555_v4 }
 0x208   :  { %v934_v31 = vpop.f32.mrf.mxu0  ;;  %3076 = vmatmul.mubr.msk.bf16.gmra.mxu0 %vm97_vm0, %v3165_v22  ;;  %v515_v32 = vpop.f32.mrf.mxu1  ;;  %3020 = vmatmul.mubr.msk.bf16.gmra.mxu1 %vm97_vm0, %v3166_v24 }
 0x209   :  { %1064 = vst.msk [vmem:[%s5259_s4 + $0x318] sm:$0xff] %vm593_vm1, %v1008_v29  ;;  %v1009_v33 = vsub.f32 %v934_v31, %v3577_v13  ;;  %640 = vst.msk [vmem:[%s5259_s4 + $0x178] sm:$0xff] %vm593_vm1, %v583_v30  ;;  %2611 = vmatprep.mubr.bf16.mxu0 %v3214_v2  ;;  %v584_v34 = vsub.f32 %v515_v32, %v3555_v4  ;;  %2194 = vmatprep.mubr.bf16.mxu1 %v3214_v2 }
 0x20a   :  { %v936_v35 = vpop.f32.mrf.mxu0  ;;  %v517_v36 = vpop.f32.mrf.mxu1 }
 0x20b   :  { %1065 = vst [vmem:[%s5259_s4 + $0x320] sm:$0xff] %v1009_v33  ;;  %v1010_v37 = vsub.f32 %v936_v35, %v3577_v13  ;;  %641 = vst [vmem:[%s5259_s4 + $0x180] sm:$0xff] %v584_v34  ;;  %v585_v38 = vsub.f32 %v517_v36, %v3555_v4  ;;  %v3173_v33 = vld [vmem:[%s5258_s3 + $0x138] sm:$0xff]   ;;  %v3174_v35 = vld [vmem:[%s5258_s3 + $0xd0] sm:$0xff]  }
 0x20c   :  { %v938_v39 = vpop.f32.mrf.mxu0  ;;  %v519_v41 = vpop.f32.mrf.mxu1 }
 0x20d   :  { %1066 = vst.msk [vmem:[%s5259_s4 + $0x328] sm:$0xff] %vm593_vm1, %v1010_v37  ;;  %v1011_v43 = vsub.f32 %v938_v39, %v3577_v13  ;;  %642 = vst.msk [vmem:[%s5259_s4 + $0x188] sm:$0xff] %vm593_vm1, %v585_v38  ;;  %v586_v44 = vsub.f32 %v519_v41, %v3555_v4 }
 0x20e   :  { %v940_v45 = vpop.f32.mrf.mxu0  ;;  %v521_v46 = vpop.f32.mrf.mxu1 }
 0x20f   :  { %1067 = vst [vmem:[%s5259_s4 + $0x330] sm:$0xff] %v1011_v43  ;;  %v1012_v47 = vsub.f32 %v940_v45, %v3577_v13  ;;  %643 = vst [vmem:[%s5259_s4 + $0x190] sm:$0xff] %v586_v44  ;;  %v587_v48 = vsub.f32 %v521_v46, %v3555_v4 }
 0x210   :  { %v944_v49 = vpop.f32.mrf.mxu0  ;;  %3077 = vmatmul.mubr.msk.bf16.gmra.mxu0 %vm97_vm0, %v3167_v40  ;;  %v525_v50 = vpop.f32.mrf.mxu1  ;;  %3021 = vmatmul.mubr.msk.bf16.gmra.mxu1 %vm97_vm0, %v3168_v42 }
 0x211   :  { %1068 = vst.msk [vmem:[%s5259_s4 + $0x338] sm:$0xff] %vm593_vm1, %v1012_v47  ;;  %v1013_v51 = vsub.f32 %v944_v49, %v3577_v13  ;;  %644 = vst.msk [vmem:[%s5259_s4 + $0x198] sm:$0xff] %vm593_vm1, %v587_v48  ;;  %2621 = vmatprep.mubr.bf16.mxu0 %v3214_v2  ;;  %v588_v52 = vsub.f32 %v525_v50, %v3555_v4  ;;  %2204 = vmatprep.mubr.bf16.mxu1 %v3214_v2 }
 0x212   :  { %v946_v53 = vpop.f32.mrf.mxu0  ;;  %v527_v54 = vpop.f32.mrf.mxu1 }
 0x213   :  { %1069 = vst [vmem:[%s5259_s4 + $0x340] sm:$0xff] %v1013_v51  ;;  %v1014_v55 = vsub.f32 %v946_v53, %v3577_v13  ;;  %645 = vst [vmem:[%s5259_s4 + $0x1a0] sm:$0xff] %v588_v52  ;;  %v589_v56 = vsub.f32 %v527_v54, %v3555_v4  ;;  %v3175_v51 = vld [vmem:[%s5258_s3 + $0x140] sm:$0xff]   ;;  %v3176_v53 = vld [vmem:[%s5258_s3 + $0xd8] sm:$0xff]  }
 0x214   :  { %v948_v57 = vpop.f32.mrf.mxu0  ;;  %v529_v59 = vpop.f32.mrf.mxu1 }
 0x215   :  { %1070 = vst.msk [vmem:[%s5259_s4 + $0x348] sm:$0xff] %vm593_vm1, %v1014_v55  ;;  %v1015_v61 = vsub.f32 %v948_v57, %v3577_v13  ;;  %646 = vst.msk [vmem:[%s5259_s4 + $0x1a8] sm:$0xff] %vm593_vm1, %v589_v56  ;;  %v590_v62 = vsub.f32 %v529_v59, %v3555_v4 }
 0x216   :  { %v950_v63 = vpop.f32.mrf.mxu0  ;;  %v531_v0 = vpop.f32.mrf.mxu1 }
 0x217   :  { %1071 = vst [vmem:[%s5259_s4 + $0x350] sm:$0xff] %v1015_v61  ;;  %v1016_v3 = vsub.f32 %v950_v63, %v3577_v13  ;;  %647 = vst [vmem:[%s5259_s4 + $0x1b0] sm:$0xff] %v590_v62  ;;  %v591_v5 = vsub.f32 %v531_v0, %v3555_v4 }
 0x218   :  { %v954_v6 = vpop.f32.mrf.mxu0  ;;  %3078 = vmatmul.mubr.msk.bf16.gmra.mxu0 %vm97_vm0, %v3169_v58  ;;  %v1252_v7 = vpop.f32.mrf.mxu1  ;;  %3022 = vmatmul.mubr.msk.bf16.gmra.mxu1 %vm97_vm0, %v3170_v60 }
 0x219   :  { %1072 = vst.msk [vmem:[%s5259_s4 + $0x358] sm:$0xff] %vm593_vm1, %v1016_v3  ;;  %v1017_v8 = vsub.f32 %v954_v6, %v3577_v13  ;;  %648 = vst.msk [vmem:[%s5259_s4 + $0x1b8] sm:$0xff] %vm593_vm1, %v591_v5  ;;  %2631 = vmatprep.mubr.bf16.mxu0 %v3214_v2  ;;  %v1393_v9 = vsub.f32 %v1252_v7, %v4172_v1  ;;  %2214 = vmatprep.mubr.bf16.mxu1 %v3214_v2 }
 0x21a   :  { %v956_v10 = vpop.f32.mrf.mxu0  ;;  %v1254_v11 = vpop.f32.mrf.mxu1 }
 0x21b   :  { %1073 = vst [vmem:[%s5259_s4 + $0x360] sm:$0xff] %v1017_v8  ;;  %v1018_v12 = vsub.f32 %v956_v10, %v3577_v13  ;;  %1449 = vst [vmem:[%s5259_s4 + $0x380] sm:$0xff] %v1393_v9  ;;  %v1394_v14 = vsub.f32 %v1254_v11, %v4172_v1 }
 0x21c   :  { %v958_v15 = vpop.f32.mrf.mxu0  ;;  %v1256_v17 = vpop.f32.mrf.mxu1 }
 0x21d   :  { %1074 = vst.msk [vmem:[%s5259_s4 + $0x368] sm:$0xff] %vm593_vm1, %v1018_v12  ;;  %v1019_v19 = vsub.f32 %v958_v15, %v3577_v13  ;;  %1450 = vst.msk [vmem:[%s5259_s4 + $0x388] sm:$0xff] %vm593_vm1, %v1394_v14  ;;  %v1395_v20 = vsub.f32 %v1256_v17, %v4172_v1 }
 0x21e   :  { %v960_v21 = vpop.f32.mrf.mxu0  ;;  %v1258_v22 = vpop.f32.mrf.mxu1 }
 0x21f   :  { %1075 = vst [vmem:[%s5259_s4 + $0x370] sm:$0xff] %v1019_v19  ;;  %v1020_v23 = vsub.f32 %v960_v21, %v3577_v13  ;;  %1451 = vst [vmem:[%s5259_s4 + $0x390] sm:$0xff] %v1395_v20  ;;  %v1396_v24 = vsub.f32 %v1258_v22, %v4172_v1 }
 0x220   :  { %v1679_v25 = vpop.f32.mrf.mxu0  ;;  %3079 = vmatmul.mubr.msk.bf16.gmra.mxu0 %vm97_vm0, %v3171_v16  ;;  %v1262_v26 = vpop.f32.mrf.mxu1  ;;  %3023 = vmatmul.mubr.msk.bf16.gmra.mxu1 %vm97_vm0, %v3172_v18 }
 0x221   :  { %1076 = vst.msk [vmem:[%s5259_s4 + $0x378] sm:$0xff] %vm593_vm1, %v1020_v23  ;;  %v1820_v27 = vsub.f32 %v1679_v25, %v3555_v4  ;;  %1452 = vst.msk [vmem:[%s5259_s4 + $0x398] sm:$0xff] %vm593_vm1, %v1396_v24  ;;  %2641 = vmatprep.mubr.bf16.mxu0 %v3214_v2  ;;  %v1397_v13 = vsub.f32 %v1262_v26, %v4172_v1  ;;  %2224 = vmatprep.mubr.bf16.mxu1 %v3214_v2 }
 0x222   :  { %v1681_v28 = vpop.f32.mrf.mxu0  ;;  %v1264_v29 = vpop.f32.mrf.mxu1 }
 0x223   :  { %1876 = vst [vmem:[%s5259_s4 + $0x540] sm:$0xff] %v1820_v27  ;;  %v1821_v30 = vsub.f32 %v1681_v28, %v3555_v4  ;;  %1453 = vst [vmem:[%s5259_s4 + $0x3a0] sm:$0xff] %v1397_v13  ;;  %v1398_v31 = vsub.f32 %v1264_v29, %v4172_v1 }
 0x224   :  { %v1683_v32 = vpop.f32.mrf.mxu0  ;;  %v1266_v34 = vpop.f32.mrf.mxu1 }
 0x225   :  { %1877 = vst.msk [vmem:[%s5259_s4 + $0x548] sm:$0xff] %vm593_vm1, %v1821_v30  ;;  %v1822_v36 = vsub.f32 %v1683_v32, %v3555_v4  ;;  %1454 = vst.msk [vmem:[%s5259_s4 + $0x3a8] sm:$0xff] %vm593_vm1, %v1398_v31  ;;  %v1399_v37 = vsub.f32 %v1266_v34, %v4172_v1 }
 0x226   :  { %v1685_v38 = vpop.f32.mrf.mxu0  ;;  %v1268_v39 = vpop.f32.mrf.mxu1 }
 0x227   :  { %1878 = vst [vmem:[%s5259_s4 + $0x550] sm:$0xff] %v1822_v36  ;;  %v1823_v40 = vsub.f32 %v1685_v38, %v3555_v4  ;;  %1455 = vst [vmem:[%s5259_s4 + $0x3b0] sm:$0xff] %v1399_v37  ;;  %v1400_v41 = vsub.f32 %v1268_v39, %v4172_v1 }
 0x228   :  { %v1689_v42 = vpop.f32.mrf.mxu0  ;;  %3080 = vmatmul.mubr.msk.bf16.gmra.mxu0 %vm97_vm0, %v3173_v33  ;;  %v1272_v43 = vpop.f32.mrf.mxu1  ;;  %3024 = vmatmul.mubr.msk.bf16.gmra.mxu1 %vm97_vm0, %v3174_v35 }
 0x229   :  { %1879 = vst.msk [vmem:[%s5259_s4 + $0x558] sm:$0xff] %vm593_vm1, %v1823_v40  ;;  %v1824_v44 = vsub.f32 %v1689_v42, %v3555_v4  ;;  %1456 = vst.msk [vmem:[%s5259_s4 + $0x3b8] sm:$0xff] %vm593_vm1, %v1400_v41  ;;  %2651 = vmatprep.mubr.bf16.mxu0 %v3214_v2  ;;  %v1401_v45 = vsub.f32 %v1272_v43, %v4172_v1  ;;  %2234 = vmatprep.mubr.bf16.mxu1 %v3214_v2 }
 0x22a   :  { %v1691_v46 = vpop.f32.mrf.mxu0  ;;  %v1274_v47 = vpop.f32.mrf.mxu1 }
 0x22b   :  { %1880 = vst [vmem:[%s5259_s4 + $0x560] sm:$0xff] %v1824_v44  ;;  %v1825_v48 = vsub.f32 %v1691_v46, %v3555_v4  ;;  %1457 = vst [vmem:[%s5259_s4 + $0x3c0] sm:$0xff] %v1401_v45  ;;  %v1402_v49 = vsub.f32 %v1274_v47, %v4172_v1 }
 0x22c   :  { %v1693_v50 = vpop.f32.mrf.mxu0  ;;  %v1276_v52 = vpop.f32.mrf.mxu1 }
 0x22d   :  { %1881 = vst.msk [vmem:[%s5259_s4 + $0x568] sm:$0xff] %vm593_vm1, %v1825_v48  ;;  %v1826_v54 = vsub.f32 %v1693_v50, %v3555_v4  ;;  %1458 = vst.msk [vmem:[%s5259_s4 + $0x3c8] sm:$0xff] %vm593_vm1, %v1402_v49  ;;  %v1403_v55 = vsub.f32 %v1276_v52, %v4172_v1 }
 0x22e   :  { %v1695_v56 = vpop.f32.mrf.mxu0  ;;  %v1278_v57 = vpop.f32.mrf.mxu1 }
 0x22f   :  { %1882 = vst [vmem:[%s5259_s4 + $0x570] sm:$0xff] %v1826_v54  ;;  %v1827_v58 = vsub.f32 %v1695_v56, %v3555_v4  ;;  %1459 = vst [vmem:[%s5259_s4 + $0x3d0] sm:$0xff] %v1403_v55  ;;  %v1404_v59 = vsub.f32 %v1278_v57, %v4172_v1 }
 0x230   :  { %v1699_v60 = vpop.f32.mrf.mxu0  ;;  %3081 = vmatmul.mubr.msk.bf16.gmra.mxu0 %vm97_vm0, %v3175_v51  ;;  %v1282_v61 = vpop.f32.mrf.mxu1  ;;  %3025 = vmatmul.mubr.msk.bf16.gmra.mxu1 %vm97_vm0, %v3176_v53 }
 0x231   :  { %1883 = vst.msk [vmem:[%s5259_s4 + $0x578] sm:$0xff] %vm593_vm1, %v1827_v58  ;;  %v1828_v62 = vsub.f32 %v1699_v60, %v3555_v4  ;;  %1460 = vst.msk [vmem:[%s5259_s4 + $0x3d8] sm:$0xff] %vm593_vm1, %v1404_v59  ;;  %2661 = vmatprep.mubr.bf16.mxu0 %v3214_v2  ;;  %v1405_v63 = vsub.f32 %v1282_v61, %v4172_v1  ;;  %v3177_v2 = vld [vmem:[%s5258_s3 + $0x148] sm:$0xff]  }
 0x232   :  { %v1701_v0 = vpop.f32.mrf.mxu0  ;;  %v1284_v3 = vpop.f32.mrf.mxu1 }
 0x233   :  { %1884 = vst [vmem:[%s5259_s4 + $0x580] sm:$0xff] %v1828_v62  ;;  %v1829_v5 = vsub.f32 %v1701_v0, %v3555_v4  ;;  %1461 = vst [vmem:[%s5259_s4 + $0x3e0] sm:$0xff] %v1405_v63  ;;  %v1406_v6 = vsub.f32 %v1284_v3, %v4172_v1 }
 0x234   :  { %v1703_v7 = vpop.f32.mrf.mxu0  ;;  %v1286_v8 = vpop.f32.mrf.mxu1 }
 0x235   :  { %1885 = vst.msk [vmem:[%s5259_s4 + $0x588] sm:$0xff] %vm593_vm1, %v1829_v5  ;;  %v1830_v9 = vsub.f32 %v1703_v7, %v3555_v4  ;;  %1462 = vst.msk [vmem:[%s5259_s4 + $0x3e8] sm:$0xff] %vm593_vm1, %v1406_v6  ;;  %v1407_v10 = vsub.f32 %v1286_v8, %v4172_v1 }
 0x236   :  { %v1705_v11 = vpop.f32.mrf.mxu0  ;;  %v1288_v12 = vpop.f32.mrf.mxu1 }
 0x237   :  { %1886 = vst [vmem:[%s5259_s4 + $0x590] sm:$0xff] %v1830_v9  ;;  %v1831_v14 = vsub.f32 %v1705_v11, %v3555_v4  ;;  %1463 = vst [vmem:[%s5259_s4 + $0x3f0] sm:$0xff] %v1407_v10  ;;  %v1408_v15 = vsub.f32 %v1288_v12, %v4172_v1 }
 0x238   :  { %v1709_v16 = vpop.f32.mrf.mxu0  ;;  %3082 = vmatmul.mubr.msk.bf16.gmra.mxu0 %vm97_vm0, %v3177_v2  ;;  %v1292_v17 = vpop.f32.mrf.mxu1 }
 0x239   :  { %1887 = vst.msk [vmem:[%s5259_s4 + $0x598] sm:$0xff] %vm593_vm1, %v1831_v14  ;;  %v1832_v18 = vsub.f32 %v1709_v16, %v3555_v4  ;;  %1464 = vst.msk [vmem:[%s5259_s4 + $0x3f8] sm:$0xff] %vm593_vm1, %v1408_v15  ;;  %v1409_v19 = vsub.f32 %v1292_v17, %v4172_v1 }
 0x23a   :  { %v1711_v20 = vpop.f32.mrf.mxu0  ;;  %v1294_v21 = vpop.f32.mrf.mxu1 }
 0x23b   :  { %1888 = vst [vmem:[%s5259_s4 + $0x5a0] sm:$0xff] %v1832_v18  ;;  %v1833_v22 = vsub.f32 %v1711_v20, %v3555_v4  ;;  %1465 = vst [vmem:[%s5259_s4 + $0x400] sm:$0xff] %v1409_v19  ;;  %v1410_v23 = vsub.f32 %v1294_v21, %v4172_v1 }
 0x23c   :  { %v1713_v24 = vpop.f32.mrf.mxu0  ;;  %v1296_v25 = vpop.f32.mrf.mxu1 }
 0x23d   :  { %1889 = vst.msk [vmem:[%s5259_s4 + $0x5a8] sm:$0xff] %vm593_vm1, %v1833_v22  ;;  %v1834_v26 = vsub.f32 %v1713_v24, %v3555_v4  ;;  %1466 = vst.msk [vmem:[%s5259_s4 + $0x408] sm:$0xff] %vm593_vm1, %v1410_v23  ;;  %v1411_v27 = vsub.f32 %v1296_v25, %v4172_v1 }
 0x23e   :  { %v1715_v13 = vpop.f32.mrf.mxu0  ;;  %v1298_v28 = vpop.f32.mrf.mxu1 }
 0x23f   :  { %1890 = vst [vmem:[%s5259_s4 + $0x5b0] sm:$0xff] %v1834_v26  ;;  %v1835_v29 = vsub.f32 %v1715_v13, %v3555_v4  ;;  %1467 = vst [vmem:[%s5259_s4 + $0x410] sm:$0xff] %v1411_v27  ;;  %v1412_v30 = vsub.f32 %v1298_v28, %v4172_v1 }
 0x240   :  { %v1719_v31 = vpop.f32.mrf.mxu0  ;;  %v1302_v32 = vpop.f32.mrf.mxu1 }
 0x241   :  { %1891 = vst.msk [vmem:[%s5259_s4 + $0x5b8] sm:$0xff] %vm593_vm1, %v1835_v29  ;;  %v1836_v33 = vsub.f32 %v1719_v31, %v3555_v4  ;;  %1468 = vst.msk [vmem:[%s5259_s4 + $0x418] sm:$0xff] %vm593_vm1, %v1412_v30  ;;  %v1413_v34 = vsub.f32 %v1302_v32, %v4172_v1 }
 0x242   :  { %v1721_v35 = vpop.f32.mrf.mxu0  ;;  %v1304_v36 = vpop.f32.mrf.mxu1 }
 0x243   :  { %1892 = vst [vmem:[%s5259_s4 + $0x5c0] sm:$0xff] %v1836_v33  ;;  %v1837_v37 = vsub.f32 %v1721_v35, %v3555_v4  ;;  %1469 = vst [vmem:[%s5259_s4 + $0x420] sm:$0xff] %v1413_v34  ;;  %v1414_v38 = vsub.f32 %v1304_v36, %v4172_v1 }
 0x244   :  { %v1723_v39 = vpop.f32.mrf.mxu0  ;;  %v1306_v40 = vpop.f32.mrf.mxu1 }
 0x245   :  { %1893 = vst.msk [vmem:[%s5259_s4 + $0x5c8] sm:$0xff] %vm593_vm1, %v1837_v37  ;;  %v1838_v41 = vsub.f32 %v1723_v39, %v3555_v4  ;;  %1470 = vst.msk [vmem:[%s5259_s4 + $0x428] sm:$0xff] %vm593_vm1, %v1414_v38  ;;  %v1415_v42 = vsub.f32 %v1306_v40, %v4172_v1 }
 0x246   :  { %v1725_v43 = vpop.f32.mrf.mxu0  ;;  %v1308_v44 = vpop.f32.mrf.mxu1 }
 0x247   :  { %1894 = vst [vmem:[%s5259_s4 + $0x5d0] sm:$0xff] %v1838_v41  ;;  %v1839_v45 = vsub.f32 %v1725_v43, %v3555_v4  ;;  %1471 = vst [vmem:[%s5259_s4 + $0x430] sm:$0xff] %v1415_v42  ;;  %v1416_v46 = vsub.f32 %v1308_v44, %v4172_v1 }
 0x248   :  { %v1729_v47 = vpop.f32.mrf.mxu0  ;;  %v1312_v48 = vpop.f32.mrf.mxu1 }
 0x249   :  { %1895 = vst.msk [vmem:[%s5259_s4 + $0x5d8] sm:$0xff] %vm593_vm1, %v1839_v45  ;;  %v1840_v49 = vsub.f32 %v1729_v47, %v3555_v4  ;;  %1472 = vst.msk [vmem:[%s5259_s4 + $0x438] sm:$0xff] %vm593_vm1, %v1416_v46  ;;  %v1417_v50 = vsub.f32 %v1312_v48, %v4172_v1 }
 0x24a   :  { %v1731_v51 = vpop.f32.mrf.mxu0  ;;  %v1314_v52 = vpop.f32.mrf.mxu1 }
 0x24b   :  { %1896 = vst [vmem:[%s5259_s4 + $0x5e0] sm:$0xff] %v1840_v49  ;;  %v1841_v53 = vsub.f32 %v1731_v51, %v3555_v4  ;;  %1473 = vst [vmem:[%s5259_s4 + $0x440] sm:$0xff] %v1417_v50  ;;  %v1418_v54 = vsub.f32 %v1314_v52, %v4172_v1 }
 0x24c   :  { %v1733_v55 = vpop.f32.mrf.mxu0  ;;  %v1316_v56 = vpop.f32.mrf.mxu1 }
 0x24d   :  { %1897 = vst.msk [vmem:[%s5259_s4 + $0x5e8] sm:$0xff] %vm593_vm1, %v1841_v53  ;;  %v1842_v57 = vsub.f32 %v1733_v55, %v3555_v4  ;;  %1474 = vst.msk [vmem:[%s5259_s4 + $0x448] sm:$0xff] %vm593_vm1, %v1418_v54  ;;  %v1419_v58 = vsub.f32 %v1316_v56, %v4172_v1 }
 0x24e   :  { %v1735_v59 = vpop.f32.mrf.mxu0  ;;  %v1318_v60 = vpop.f32.mrf.mxu1 }
 0x24f   :  { %1898 = vst [vmem:[%s5259_s4 + $0x5f0] sm:$0xff] %v1842_v57  ;;  %v1843_v61 = vsub.f32 %v1735_v59, %v3555_v4  ;;  %1475 = vst [vmem:[%s5259_s4 + $0x450] sm:$0xff] %v1419_v58  ;;  %v1420_v62 = vsub.f32 %v1318_v60, %v4172_v1 }
 0x250   :  { %v1739_v63 = vpop.f32.mrf.mxu0  ;;  %v1322_v0 = vpop.f32.mrf.mxu1 }
 0x251   :  { %1899 = vst.msk [vmem:[%s5259_s4 + $0x5f8] sm:$0xff] %vm593_vm1, %v1843_v61  ;;  %v1844_v3 = vsub.f32 %v1739_v63, %v3555_v4  ;;  %1476 = vst.msk [vmem:[%s5259_s4 + $0x458] sm:$0xff] %vm593_vm1, %v1420_v62  ;;  %v1421_v5 = vsub.f32 %v1322_v0, %v4172_v1 }
 0x252   :  { %v1741_v6 = vpop.f32.mrf.mxu0  ;;  %v1324_v7 = vpop.f32.mrf.mxu1 }
 0x253   :  { %1900 = vst [vmem:[%s5259_s4 + $0x600] sm:$0xff] %v1844_v3  ;;  %v1845_v2 = vsub.f32 %v1741_v6, %v3555_v4  ;;  %1477 = vst [vmem:[%s5259_s4 + $0x460] sm:$0xff] %v1421_v5  ;;  %v1422_v8 = vsub.f32 %v1324_v7, %v4172_v1 }
 0x254   :  { %v1743_v9 = vpop.f32.mrf.mxu0  ;;  %v1326_v10 = vpop.f32.mrf.mxu1 }
 0x255   :  { %1901 = vst.msk [vmem:[%s5259_s4 + $0x608] sm:$0xff] %vm593_vm1, %v1845_v2  ;;  %v1846_v11 = vsub.f32 %v1743_v9, %v3555_v4  ;;  %1478 = vst.msk [vmem:[%s5259_s4 + $0x468] sm:$0xff] %vm593_vm1, %v1422_v8  ;;  %v1423_v12 = vsub.f32 %v1326_v10, %v4172_v1 }
 0x256   :  { %v1745_v14 = vpop.f32.mrf.mxu0  ;;  %v1328_v15 = vpop.f32.mrf.mxu1 }
 0x257   :  { %1902 = vst [vmem:[%s5259_s4 + $0x610] sm:$0xff] %v1846_v11  ;;  %v1847_v16 = vsub.f32 %v1745_v14, %v3555_v4  ;;  %1479 = vst [vmem:[%s5259_s4 + $0x470] sm:$0xff] %v1423_v12  ;;  %v1424_v17 = vsub.f32 %v1328_v15, %v4172_v1 }
 0x258   :  { %v1749_v18 = vpop.f32.mrf.mxu0  ;;  %v1332_v19 = vpop.f32.mrf.mxu1 }
 0x259   :  { %1903 = vst.msk [vmem:[%s5259_s4 + $0x618] sm:$0xff] %vm593_vm1, %v1847_v16  ;;  %v1848_v20 = vsub.f32 %v1749_v18, %v3555_v4  ;;  %1480 = vst.msk [vmem:[%s5259_s4 + $0x478] sm:$0xff] %vm593_vm1, %v1424_v17  ;;  %v1425_v21 = vsub.f32 %v1332_v19, %v4172_v1 }
 0x25a   :  { %v1751_v22 = vpop.f32.mrf.mxu0  ;;  %v1334_v23 = vpop.f32.mrf.mxu1 }
 0x25b   :  { %1904 = vst [vmem:[%s5259_s4 + $0x620] sm:$0xff] %v1848_v20  ;;  %v1849_v24 = vsub.f32 %v1751_v22, %v3555_v4  ;;  %1481 = vst [vmem:[%s5259_s4 + $0x480] sm:$0xff] %v1425_v21  ;;  %v1426_v25 = vsub.f32 %v1334_v23, %v4172_v1 }
 0x25c   :  { %v1753_v26 = vpop.f32.mrf.mxu0  ;;  %v1336_v27 = vpop.f32.mrf.mxu1 }
 0x25d   :  { %1905 = vst.msk [vmem:[%s5259_s4 + $0x628] sm:$0xff] %vm593_vm1, %v1849_v24  ;;  %v1850_v13 = vsub.f32 %v1753_v26, %v3555_v4  ;;  %1482 = vst.msk [vmem:[%s5259_s4 + $0x488] sm:$0xff] %vm593_vm1, %v1426_v25  ;;  %v1427_v28 = vsub.f32 %v1336_v27, %v4172_v1 }
 0x25e   :  { %v1755_v29 = vpop.f32.mrf.mxu0  ;;  %v1338_v30 = vpop.f32.mrf.mxu1 }
 0x25f   :  { %1906 = vst [vmem:[%s5259_s4 + $0x630] sm:$0xff] %v1850_v13  ;;  %v1851_v31 = vsub.f32 %v1755_v29, %v3555_v4  ;;  %1483 = vst [vmem:[%s5259_s4 + $0x490] sm:$0xff] %v1427_v28  ;;  %v1428_v32 = vsub.f32 %v1338_v30, %v4172_v1 }
 0x260   :  { %v1759_v33 = vpop.f32.mrf.mxu0  ;;  %v1342_v34 = vpop.f32.mrf.mxu1 }
 0x261   :  { %1907 = vst.msk [vmem:[%s5259_s4 + $0x638] sm:$0xff] %vm593_vm1, %v1851_v31  ;;  %v1852_v35 = vsub.f32 %v1759_v33, %v3555_v4  ;;  %1484 = vst.msk [vmem:[%s5259_s4 + $0x498] sm:$0xff] %vm593_vm1, %v1428_v32  ;;  %v1429_v36 = vsub.f32 %v1342_v34, %v4172_v1 }
 0x262   :  { %v1761_v37 = vpop.f32.mrf.mxu0  ;;  %v1344_v38 = vpop.f32.mrf.mxu1 }
 0x263   :  { %1908 = vst [vmem:[%s5259_s4 + $0x640] sm:$0xff] %v1852_v35  ;;  %v1853_v39 = vsub.f32 %v1761_v37, %v3555_v4  ;;  %1485 = vst [vmem:[%s5259_s4 + $0x4a0] sm:$0xff] %v1429_v36  ;;  %v1430_v40 = vsub.f32 %v1344_v38, %v4172_v1 }
 0x264   :  { %v1763_v41 = vpop.f32.mrf.mxu0  ;;  %v1346_v42 = vpop.f32.mrf.mxu1 }
 0x265   :  { %1909 = vst.msk [vmem:[%s5259_s4 + $0x648] sm:$0xff] %vm593_vm1, %v1853_v39  ;;  %v1854_v43 = vsub.f32 %v1763_v41, %v3555_v4  ;;  %1486 = vst.msk [vmem:[%s5259_s4 + $0x4a8] sm:$0xff] %vm593_vm1, %v1430_v40  ;;  %v1431_v44 = vsub.f32 %v1346_v42, %v4172_v1 }
 0x266   :  { %v1765_v45 = vpop.f32.mrf.mxu0  ;;  %v1348_v46 = vpop.f32.mrf.mxu1 }
 0x267   :  { %1910 = vst [vmem:[%s5259_s4 + $0x650] sm:$0xff] %v1854_v43  ;;  %v1855_v47 = vsub.f32 %v1765_v45, %v3555_v4  ;;  %1487 = vst [vmem:[%s5259_s4 + $0x4b0] sm:$0xff] %v1431_v44  ;;  %v1432_v48 = vsub.f32 %v1348_v46, %v4172_v1 }
 0x268   :  { %v1769_v49 = vpop.f32.mrf.mxu0  ;;  %v1352_v50 = vpop.f32.mrf.mxu1 }
 0x269   :  { %1911 = vst.msk [vmem:[%s5259_s4 + $0x658] sm:$0xff] %vm593_vm1, %v1855_v47  ;;  %v1856_v51 = vsub.f32 %v1769_v49, %v3555_v4  ;;  %1488 = vst.msk [vmem:[%s5259_s4 + $0x4b8] sm:$0xff] %vm593_vm1, %v1432_v48  ;;  %v1433_v52 = vsub.f32 %v1352_v50, %v4172_v1  ;;  %v4715_v49 = vstv %s3026_s22 }
 0x26a   :  { %v1771_v53 = vpop.f32.mrf.mxu0  ;;  %v1354_v54 = vpop.f32.mrf.mxu1 }
 0x26b   :  { %1912 = vst [vmem:[%s5259_s4 + $0x660] sm:$0xff] %v1856_v51  ;;  %v1857_v55 = vsub.f32 %v1771_v53, %v3555_v4  ;;  %1489 = vst [vmem:[%s5259_s4 + $0x4c0] sm:$0xff] %v1433_v52  ;;  %v1434_v56 = vsub.f32 %v1354_v54, %v4172_v1 }
 0x26c   :  { %v1773_v57 = vpop.f32.mrf.mxu0  ;;  %v1356_v58 = vpop.f32.mrf.mxu1 }
 0x26d   :  { %1913 = vst.msk [vmem:[%s5259_s4 + $0x668] sm:$0xff] %vm593_vm1, %v1857_v55  ;;  %v1858_v59 = vsub.f32 %v1773_v57, %v3555_v4  ;;  %1490 = vst.msk [vmem:[%s5259_s4 + $0x4c8] sm:$0xff] %vm593_vm1, %v1434_v56  ;;  %v1435_v60 = vsub.f32 %v1356_v58, %v4172_v1 }
 0x26e   :  { %v1775_v61 = vpop.f32.mrf.mxu0  ;;  %v1358_v62 = vpop.f32.mrf.mxu1 }
 0x26f   :  { %1914 = vst [vmem:[%s5259_s4 + $0x670] sm:$0xff] %v1858_v59  ;;  %v1859_v63 = vsub.f32 %v1775_v61, %v3555_v4  ;;  %1491 = vst [vmem:[%s5259_s4 + $0x4d0] sm:$0xff] %v1435_v60  ;;  %v1436_v0 = vsub.f32 %v1358_v62, %v4172_v1 }
 0x270   :  { %v1779_v3 = vpop.f32.mrf.mxu0  ;;  %v1362_v5 = vpop.f32.mrf.mxu1 }
 0x271   :  { %1915 = vst.msk [vmem:[%s5259_s4 + $0x678] sm:$0xff] %vm593_vm1, %v1859_v63  ;;  %v1860_v6 = vsub.f32 %v1779_v3, %v3555_v4  ;;  %1492 = vst.msk [vmem:[%s5259_s4 + $0x4d8] sm:$0xff] %vm593_vm1, %v1436_v0  ;;  %v1437_v7 = vsub.f32 %v1362_v5, %v4172_v1 }
 0x272   :  { %v1781_v2 = vpop.f32.mrf.mxu0  ;;  %v1364_v8 = vpop.f32.mrf.mxu1 }
 0x273   :  { %1916 = vst [vmem:[%s5259_s4 + $0x680] sm:$0xff] %v1860_v6  ;;  %v1861_v9 = vsub.f32 %v1781_v2, %v3555_v4  ;;  %1493 = vst [vmem:[%s5259_s4 + $0x4e0] sm:$0xff] %v1437_v7  ;;  %v1438_v10 = vsub.f32 %v1364_v8, %v4172_v1 }
 0x274   :  { %v1783_v11 = vpop.f32.mrf.mxu0  ;;  %v1366_v12 = vpop.f32.mrf.mxu1 }
 0x275   :  { %1917 = vst.msk [vmem:[%s5259_s4 + $0x688] sm:$0xff] %vm593_vm1, %v1861_v9  ;;  %v1862_v14 = vsub.f32 %v1783_v11, %v3555_v4  ;;  %1494 = vst.msk [vmem:[%s5259_s4 + $0x4e8] sm:$0xff] %vm593_vm1, %v1438_v10  ;;  %v1439_v15 = vsub.f32 %v1366_v12, %v4172_v1 }
 0x276   :  { %v1785_v16 = vpop.f32.mrf.mxu0  ;;  %v1368_v17 = vpop.f32.mrf.mxu1 }
 0x277   :  { %1918 = vst [vmem:[%s5259_s4 + $0x690] sm:$0xff] %v1862_v14  ;;  %v1863_v18 = vsub.f32 %v1785_v16, %v3555_v4  ;;  %1495 = vst [vmem:[%s5259_s4 + $0x4f0] sm:$0xff] %v1439_v15  ;;  %v1440_v19 = vsub.f32 %v1368_v17, %v4172_v1 }
 0x278   :  { %v1789_v20 = vpop.f32.mrf.mxu0  ;;  %v1372_v21 = vpop.f32.mrf.mxu1 }
 0x279   :  { %1919 = vst.msk [vmem:[%s5259_s4 + $0x698] sm:$0xff] %vm593_vm1, %v1863_v18  ;;  %v1864_v22 = vsub.f32 %v1789_v20, %v3555_v4  ;;  %1496 = vst.msk [vmem:[%s5259_s4 + $0x4f8] sm:$0xff] %vm593_vm1, %v1440_v19  ;;  %v1441_v23 = vsub.f32 %v1372_v21, %v4172_v1 }
 0x27a   :  { %v1791_v24 = vpop.f32.mrf.mxu0  ;;  %v1374_v25 = vpop.f32.mrf.mxu1 }
 0x27b   :  { %1920 = vst [vmem:[%s5259_s4 + $0x6a0] sm:$0xff] %v1864_v22  ;;  %v1865_v26 = vsub.f32 %v1791_v24, %v3555_v4  ;;  %1497 = vst [vmem:[%s5259_s4 + $0x500] sm:$0xff] %v1441_v23  ;;  %v1442_v27 = vsub.f32 %v1374_v25, %v4172_v1 }
 0x27c   :  { %v1793_v13 = vpop.f32.mrf.mxu0  ;;  %v1376_v28 = vpop.f32.mrf.mxu1 }
 0x27d   :  { %1921 = vst.msk [vmem:[%s5259_s4 + $0x6a8] sm:$0xff] %vm593_vm1, %v1865_v26  ;;  %v1866_v29 = vsub.f32 %v1793_v13, %v3555_v4  ;;  %1498 = vst.msk [vmem:[%s5259_s4 + $0x508] sm:$0xff] %vm593_vm1, %v1442_v27  ;;  %v1443_v30 = vsub.f32 %v1376_v28, %v4172_v1 }
 0x27e   :  { %v1795_v31 = vpop.f32.mrf.mxu0  ;;  %v1378_v32 = vpop.f32.mrf.mxu1 }
 0x27f   :  { %1922 = vst [vmem:[%s5259_s4 + $0x6b0] sm:$0xff] %v1866_v29  ;;  %v1867_v33 = vsub.f32 %v1795_v31, %v3555_v4  ;;  %1499 = vst [vmem:[%s5259_s4 + $0x510] sm:$0xff] %v1443_v30  ;;  %v1444_v34 = vsub.f32 %v1378_v32, %v4172_v1 }
 0x280   :  { %v1799_v35 = vpop.f32.mrf.mxu0  ;;  %v1382_v36 = vpop.f32.mrf.mxu1 }
 0x281   :  { %1923 = vst.msk [vmem:[%s5259_s4 + $0x6b8] sm:$0xff] %vm593_vm1, %v1867_v33  ;;  %v1868_v37 = vsub.f32 %v1799_v35, %v3555_v4  ;;  %1500 = vst.msk [vmem:[%s5259_s4 + $0x518] sm:$0xff] %vm593_vm1, %v1444_v34  ;;  %v1445_v38 = vsub.f32 %v1382_v36, %v4172_v1 }
 0x282   :  { %v1801_v39 = vpop.f32.mrf.mxu0  ;;  %v1384_v40 = vpop.f32.mrf.mxu1 }
 0x283   :  { %1924 = vst [vmem:[%s5259_s4 + $0x6c0] sm:$0xff] %v1868_v37  ;;  %v1869_v41 = vsub.f32 %v1801_v39, %v3555_v4  ;;  %1501 = vst [vmem:[%s5259_s4 + $0x520] sm:$0xff] %v1445_v38  ;;  %v1446_v42 = vsub.f32 %v1384_v40, %v4172_v1 }
 0x284   :  { %v1803_v43 = vpop.f32.mrf.mxu0  ;;  %v1386_v44 = vpop.f32.mrf.mxu1 }
 0x285   :  { %1925 = vst.msk [vmem:[%s5259_s4 + $0x6c8] sm:$0xff] %vm593_vm1, %v1869_v41  ;;  %v1870_v45 = vsub.f32 %v1803_v43, %v3555_v4  ;;  %1502 = vst.msk [vmem:[%s5259_s4 + $0x528] sm:$0xff] %vm593_vm1, %v1446_v42  ;;  %v1447_v46 = vsub.f32 %v1386_v44, %v4172_v1 }
 0x286   :  { %v1805_v47 = vpop.f32.mrf.mxu0  ;;  %v1388_v48 = vpop.f32.mrf.mxu1 }
 0x287   :  { %1926 = vst [vmem:[%s5259_s4 + $0x6d0] sm:$0xff] %v1870_v45  ;;  %v1871_v50 = vsub.f32 %v1805_v47, %v3555_v4  ;;  %1503 = vst [vmem:[%s5259_s4 + $0x530] sm:$0xff] %v1447_v46  ;;  %v1448_v51 = vsub.f32 %v1388_v48, %v4172_v1 }
 0x288   :  { %v1809_v52 = vpop.f32.mrf.mxu0  ;;  %v2106_v53 = vpop.f32.mrf.mxu1 }
 0x289   :  { %1927 = vst.msk [vmem:[%s5259_s4 + $0x6d8] sm:$0xff] %vm593_vm1, %v1871_v50  ;;  %v1872_v54 = vsub.f32 %v1809_v52, %v3555_v4  ;;  %1504 = vst.msk [vmem:[%s5259_s4 + $0x538] sm:$0xff] %vm593_vm1, %v1448_v51  ;;  %v2247_v55 = vsub.f32 %v2106_v53, %v4715_v49 }
 0x28a   :  { %v1811_v56 = vpop.f32.mrf.mxu0  ;;  %v2108_v57 = vpop.f32.mrf.mxu1 }
 0x28b   :  { %1928 = vst [vmem:[%s5259_s4 + $0x6e0] sm:$0xff] %v1872_v54  ;;  %v1873_v58 = vsub.f32 %v1811_v56, %v3555_v4  ;;  %2303 = vst [vmem:[%s5259_s4 + $0x700] sm:$0xff] %v2247_v55  ;;  %v2248_v59 = vsub.f32 %v2108_v57, %v4715_v49 }
 0x28c   :  { %v1813_v60 = vpop.f32.mrf.mxu0  ;;  %v2110_v61 = vpop.f32.mrf.mxu1 }
 0x28d   :  { %1929 = vst.msk [vmem:[%s5259_s4 + $0x6e8] sm:$0xff] %vm593_vm1, %v1873_v58  ;;  %v1874_v62 = vsub.f32 %v1813_v60, %v3555_v4  ;;  %2304 = vst.msk [vmem:[%s5259_s4 + $0x708] sm:$0xff] %vm593_vm1, %v2248_v59  ;;  %v2249_v63 = vsub.f32 %v2110_v61, %v4715_v49 }
 0x28e   :  { %v1815_v0 = vpop.f32.mrf.mxu0  ;;  %v2112_v3 = vpop.f32.mrf.mxu1 }
 0x28f   :  { %1930 = vst [vmem:[%s5259_s4 + $0x6f0] sm:$0xff] %v1874_v62  ;;  %v1875_v5 = vsub.f32 %v1815_v0, %v3555_v4  ;;  %2305 = vst [vmem:[%s5259_s4 + $0x710] sm:$0xff] %v2249_v63  ;;  %v2250_v6 = vsub.f32 %v2112_v3, %v4715_v49 }
 0x290   :  { %v2533_v7 = vpop.f32.mrf.mxu0  ;;  %v2116_v2 = vpop.f32.mrf.mxu1 }
 0x291   :  { %1931 = vst.msk [vmem:[%s5259_s4 + $0x6f8] sm:$0xff] %vm593_vm1, %v1875_v5  ;;  %v2674_v8 = vsub.f32 %v2533_v7, %v4172_v1  ;;  %2306 = vst.msk [vmem:[%s5259_s4 + $0x718] sm:$0xff] %vm593_vm1, %v2250_v6  ;;  %v2251_v4 = vsub.f32 %v2116_v2, %v4715_v49 }
 0x292   :  { %v2535_v9 = vpop.f32.mrf.mxu0  ;;  %v2118_v10 = vpop.f32.mrf.mxu1 }
 0x293   :  { %2730 = vst [vmem:[%s5259_s4 + $0x8c0] sm:$0xff] %v2674_v8  ;;  %v2675_v11 = vsub.f32 %v2535_v9, %v4172_v1  ;;  %2307 = vst [vmem:[%s5259_s4 + $0x720] sm:$0xff] %v2251_v4  ;;  %v2252_v12 = vsub.f32 %v2118_v10, %v4715_v49 }
 0x294   :  { %v2537_v14 = vpop.f32.mrf.mxu0  ;;  %v2120_v15 = vpop.f32.mrf.mxu1 }
 0x295   :  { %2731 = vst.msk [vmem:[%s5259_s4 + $0x8c8] sm:$0xff] %vm593_vm1, %v2675_v11  ;;  %v2676_v16 = vsub.f32 %v2537_v14, %v4172_v1  ;;  %2308 = vst.msk [vmem:[%s5259_s4 + $0x728] sm:$0xff] %vm593_vm1, %v2252_v12  ;;  %v2253_v17 = vsub.f32 %v2120_v15, %v4715_v49 }
 0x296   :  { %v2539_v18 = vpop.f32.mrf.mxu0  ;;  %v2122_v19 = vpop.f32.mrf.mxu1 }
 0x297   :  { %2732 = vst [vmem:[%s5259_s4 + $0x8d0] sm:$0xff] %v2676_v16  ;;  %v2677_v20 = vsub.f32 %v2539_v18, %v4172_v1  ;;  %2309 = vst [vmem:[%s5259_s4 + $0x730] sm:$0xff] %v2253_v17  ;;  %v2254_v21 = vsub.f32 %v2122_v19, %v4715_v49 }
 0x298   :  { %v2543_v22 = vpop.f32.mrf.mxu0  ;;  %v2126_v23 = vpop.f32.mrf.mxu1 }
 0x299   :  { %2733 = vst.msk [vmem:[%s5259_s4 + $0x8d8] sm:$0xff] %vm593_vm1, %v2677_v20  ;;  %v2678_v24 = vsub.f32 %v2543_v22, %v4172_v1  ;;  %2310 = vst.msk [vmem:[%s5259_s4 + $0x738] sm:$0xff] %vm593_vm1, %v2254_v21  ;;  %v2255_v25 = vsub.f32 %v2126_v23, %v4715_v49 }
 0x29a   :  { %v2545_v26 = vpop.f32.mrf.mxu0  ;;  %v2128_v27 = vpop.f32.mrf.mxu1 }
 0x29b   :  { %2734 = vst [vmem:[%s5259_s4 + $0x8e0] sm:$0xff] %v2678_v24  ;;  %v2679_v13 = vsub.f32 %v2545_v26, %v4172_v1  ;;  %2311 = vst [vmem:[%s5259_s4 + $0x740] sm:$0xff] %v2255_v25  ;;  %v2256_v28 = vsub.f32 %v2128_v27, %v4715_v49 }
 0x29c   :  { %v2547_v29 = vpop.f32.mrf.mxu0  ;;  %v2130_v30 = vpop.f32.mrf.mxu1 }
 0x29d   :  { %2735 = vst.msk [vmem:[%s5259_s4 + $0x8e8] sm:$0xff] %vm593_vm1, %v2679_v13  ;;  %v2680_v31 = vsub.f32 %v2547_v29, %v4172_v1  ;;  %2312 = vst.msk [vmem:[%s5259_s4 + $0x748] sm:$0xff] %vm593_vm1, %v2256_v28  ;;  %v2257_v32 = vsub.f32 %v2130_v30, %v4715_v49 }
 0x29e   :  { %v2549_v33 = vpop.f32.mrf.mxu0  ;;  %v2132_v34 = vpop.f32.mrf.mxu1 }
 0x29f   :  { %2736 = vst [vmem:[%s5259_s4 + $0x8f0] sm:$0xff] %v2680_v31  ;;  %v2681_v35 = vsub.f32 %v2549_v33, %v4172_v1  ;;  %2313 = vst [vmem:[%s5259_s4 + $0x750] sm:$0xff] %v2257_v32  ;;  %v2258_v36 = vsub.f32 %v2132_v34, %v4715_v49 }
 0x2a0   :  { %v2553_v37 = vpop.f32.mrf.mxu0  ;;  %v2136_v38 = vpop.f32.mrf.mxu1 }
 0x2a1   :  { %2737 = vst.msk [vmem:[%s5259_s4 + $0x8f8] sm:$0xff] %vm593_vm1, %v2681_v35  ;;  %v2682_v39 = vsub.f32 %v2553_v37, %v4172_v1  ;;  %2314 = vst.msk [vmem:[%s5259_s4 + $0x758] sm:$0xff] %vm593_vm1, %v2258_v36  ;;  %v2259_v40 = vsub.f32 %v2136_v38, %v4715_v49 }
 0x2a2   :  { %v2555_v41 = vpop.f32.mrf.mxu0  ;;  %v2138_v42 = vpop.f32.mrf.mxu1 }
 0x2a3   :  { %2738 = vst [vmem:[%s5259_s4 + $0x900] sm:$0xff] %v2682_v39  ;;  %v2683_v43 = vsub.f32 %v2555_v41, %v4172_v1  ;;  %2315 = vst [vmem:[%s5259_s4 + $0x760] sm:$0xff] %v2259_v40  ;;  %v2260_v44 = vsub.f32 %v2138_v42, %v4715_v49 }
 0x2a4   :  { %v2557_v45 = vpop.f32.mrf.mxu0  ;;  %v2140_v46 = vpop.f32.mrf.mxu1 }
 0x2a5   :  { %2739 = vst.msk [vmem:[%s5259_s4 + $0x908] sm:$0xff] %vm593_vm1, %v2683_v43  ;;  %v2684_v47 = vsub.f32 %v2557_v45, %v4172_v1  ;;  %2316 = vst.msk [vmem:[%s5259_s4 + $0x768] sm:$0xff] %vm593_vm1, %v2260_v44  ;;  %v2261_v48 = vsub.f32 %v2140_v46, %v4715_v49 }
 0x2a6   :  { %v2559_v50 = vpop.f32.mrf.mxu0  ;;  %v2142_v51 = vpop.f32.mrf.mxu1 }
 0x2a7   :  { %2740 = vst [vmem:[%s5259_s4 + $0x910] sm:$0xff] %v2684_v47  ;;  %v2685_v52 = vsub.f32 %v2559_v50, %v4172_v1  ;;  %2317 = vst [vmem:[%s5259_s4 + $0x770] sm:$0xff] %v2261_v48  ;;  %v2262_v53 = vsub.f32 %v2142_v51, %v4715_v49 }
 0x2a8   :  { %v2563_v54 = vpop.f32.mrf.mxu0  ;;  %v2146_v55 = vpop.f32.mrf.mxu1 }
 0x2a9   :  { %2741 = vst.msk [vmem:[%s5259_s4 + $0x918] sm:$0xff] %vm593_vm1, %v2685_v52  ;;  %v2686_v56 = vsub.f32 %v2563_v54, %v4172_v1  ;;  %2318 = vst.msk [vmem:[%s5259_s4 + $0x778] sm:$0xff] %vm593_vm1, %v2262_v53  ;;  %v2263_v57 = vsub.f32 %v2146_v55, %v4715_v49 }
 0x2aa   :  { %v2565_v58 = vpop.f32.mrf.mxu0  ;;  %v2148_v59 = vpop.f32.mrf.mxu1 }
 0x2ab   :  { %2742 = vst [vmem:[%s5259_s4 + $0x920] sm:$0xff] %v2686_v56  ;;  %v2687_v60 = vsub.f32 %v2565_v58, %v4172_v1  ;;  %2319 = vst [vmem:[%s5259_s4 + $0x780] sm:$0xff] %v2263_v57  ;;  %v2264_v61 = vsub.f32 %v2148_v59, %v4715_v49 }
 0x2ac   :  { %v2567_v62 = vpop.f32.mrf.mxu0  ;;  %v2150_v63 = vpop.f32.mrf.mxu1 }
 0x2ad   :  { %2743 = vst.msk [vmem:[%s5259_s4 + $0x928] sm:$0xff] %vm593_vm1, %v2687_v60  ;;  %v2688_v0 = vsub.f32 %v2567_v62, %v4172_v1  ;;  %2320 = vst.msk [vmem:[%s5259_s4 + $0x788] sm:$0xff] %vm593_vm1, %v2264_v61  ;;  %v2265_v3 = vsub.f32 %v2150_v63, %v4715_v49 }
 0x2ae   :  { %v2569_v5 = vpop.f32.mrf.mxu0  ;;  %v2152_v6 = vpop.f32.mrf.mxu1 }
 0x2af   :  { %2744 = vst [vmem:[%s5259_s4 + $0x930] sm:$0xff] %v2688_v0  ;;  %v2689_v7 = vsub.f32 %v2569_v5, %v4172_v1  ;;  %2321 = vst [vmem:[%s5259_s4 + $0x790] sm:$0xff] %v2265_v3  ;;  %v2266_v2 = vsub.f32 %v2152_v6, %v4715_v49 }
 0x2b0   :  { %v2573_v8 = vpop.f32.mrf.mxu0  ;;  %v2156_v4 = vpop.f32.mrf.mxu1 }
 0x2b1   :  { %2745 = vst.msk [vmem:[%s5259_s4 + $0x938] sm:$0xff] %vm593_vm1, %v2689_v7  ;;  %v2690_v9 = vsub.f32 %v2573_v8, %v4172_v1  ;;  %2322 = vst.msk [vmem:[%s5259_s4 + $0x798] sm:$0xff] %vm593_vm1, %v2266_v2  ;;  %v2267_v10 = vsub.f32 %v2156_v4, %v4715_v49 }
 0x2b2   :  { %v2575_v11 = vpop.f32.mrf.mxu0  ;;  %v2158_v12 = vpop.f32.mrf.mxu1 }
 0x2b3   :  { %2746 = vst [vmem:[%s5259_s4 + $0x940] sm:$0xff] %v2690_v9  ;;  %v2691_v14 = vsub.f32 %v2575_v11, %v4172_v1  ;;  %2323 = vst [vmem:[%s5259_s4 + $0x7a0] sm:$0xff] %v2267_v10  ;;  %v2268_v15 = vsub.f32 %v2158_v12, %v4715_v49 }
 0x2b4   :  { %v2577_v16 = vpop.f32.mrf.mxu0  ;;  %v2160_v17 = vpop.f32.mrf.mxu1 }
 0x2b5   :  { %2747 = vst.msk [vmem:[%s5259_s4 + $0x948] sm:$0xff] %vm593_vm1, %v2691_v14  ;;  %v2692_v18 = vsub.f32 %v2577_v16, %v4172_v1  ;;  %2324 = vst.msk [vmem:[%s5259_s4 + $0x7a8] sm:$0xff] %vm593_vm1, %v2268_v15  ;;  %v2269_v19 = vsub.f32 %v2160_v17, %v4715_v49 }
 0x2b6   :  { %v2579_v20 = vpop.f32.mrf.mxu0  ;;  %v2162_v21 = vpop.f32.mrf.mxu1 }
 0x2b7   :  { %2748 = vst [vmem:[%s5259_s4 + $0x950] sm:$0xff] %v2692_v18  ;;  %v2693_v22 = vsub.f32 %v2579_v20, %v4172_v1  ;;  %2325 = vst [vmem:[%s5259_s4 + $0x7b0] sm:$0xff] %v2269_v19  ;;  %v2270_v23 = vsub.f32 %v2162_v21, %v4715_v49 }
 0x2b8   :  { %v2583_v24 = vpop.f32.mrf.mxu0  ;;  %v2166_v25 = vpop.f32.mrf.mxu1 }
 0x2b9   :  { %2749 = vst.msk [vmem:[%s5259_s4 + $0x958] sm:$0xff] %vm593_vm1, %v2693_v22  ;;  %v2694_v26 = vsub.f32 %v2583_v24, %v4172_v1  ;;  %2326 = vst.msk [vmem:[%s5259_s4 + $0x7b8] sm:$0xff] %vm593_vm1, %v2270_v23  ;;  %v2271_v27 = vsub.f32 %v2166_v25, %v4715_v49 }
 0x2ba   :  { %v2585_v13 = vpop.f32.mrf.mxu0  ;;  %v2168_v28 = vpop.f32.mrf.mxu1 }
 0x2bb   :  { %2750 = vst [vmem:[%s5259_s4 + $0x960] sm:$0xff] %v2694_v26  ;;  %v2695_v29 = vsub.f32 %v2585_v13, %v4172_v1  ;;  %2327 = vst [vmem:[%s5259_s4 + $0x7c0] sm:$0xff] %v2271_v27  ;;  %v2272_v30 = vsub.f32 %v2168_v28, %v4715_v49 }
 0x2bc   :  { %v2587_v31 = vpop.f32.mrf.mxu0  ;;  %v2170_v32 = vpop.f32.mrf.mxu1 }
 0x2bd   :  { %2751 = vst.msk [vmem:[%s5259_s4 + $0x968] sm:$0xff] %vm593_vm1, %v2695_v29  ;;  %v2696_v33 = vsub.f32 %v2587_v31, %v4172_v1  ;;  %2328 = vst.msk [vmem:[%s5259_s4 + $0x7c8] sm:$0xff] %vm593_vm1, %v2272_v30  ;;  %v2273_v34 = vsub.f32 %v2170_v32, %v4715_v49 }
 0x2be   :  { %v2589_v35 = vpop.f32.mrf.mxu0  ;;  %v2172_v36 = vpop.f32.mrf.mxu1 }
 0x2bf   :  { %2752 = vst [vmem:[%s5259_s4 + $0x970] sm:$0xff] %v2696_v33  ;;  %v2697_v37 = vsub.f32 %v2589_v35, %v4172_v1  ;;  %2329 = vst [vmem:[%s5259_s4 + $0x7d0] sm:$0xff] %v2273_v34  ;;  %v2274_v38 = vsub.f32 %v2172_v36, %v4715_v49 }
 0x2c0   :  { %v2593_v39 = vpop.f32.mrf.mxu0  ;;  %v2176_v40 = vpop.f32.mrf.mxu1 }
 0x2c1   :  { %2753 = vst.msk [vmem:[%s5259_s4 + $0x978] sm:$0xff] %vm593_vm1, %v2697_v37  ;;  %v2698_v41 = vsub.f32 %v2593_v39, %v4172_v1  ;;  %2330 = vst.msk [vmem:[%s5259_s4 + $0x7d8] sm:$0xff] %vm593_vm1, %v2274_v38  ;;  %v2275_v42 = vsub.f32 %v2176_v40, %v4715_v49 }
 0x2c2   :  { %v2595_v43 = vpop.f32.mrf.mxu0  ;;  %v2178_v44 = vpop.f32.mrf.mxu1 }
 0x2c3   :  { %2754 = vst [vmem:[%s5259_s4 + $0x980] sm:$0xff] %v2698_v41  ;;  %v2699_v45 = vsub.f32 %v2595_v43, %v4172_v1  ;;  %2331 = vst [vmem:[%s5259_s4 + $0x7e0] sm:$0xff] %v2275_v42  ;;  %v2276_v46 = vsub.f32 %v2178_v44, %v4715_v49 }
 0x2c4   :  { %v2597_v47 = vpop.f32.mrf.mxu0  ;;  %v2180_v48 = vpop.f32.mrf.mxu1 }
 0x2c5   :  { %2755 = vst.msk [vmem:[%s5259_s4 + $0x988] sm:$0xff] %vm593_vm1, %v2699_v45  ;;  %v2700_v50 = vsub.f32 %v2597_v47, %v4172_v1  ;;  %2332 = vst.msk [vmem:[%s5259_s4 + $0x7e8] sm:$0xff] %vm593_vm1, %v2276_v46  ;;  %v2277_v51 = vsub.f32 %v2180_v48, %v4715_v49 }
 0x2c6   :  { %v2599_v52 = vpop.f32.mrf.mxu0  ;;  %v2182_v53 = vpop.f32.mrf.mxu1 }
 0x2c7   :  { %2756 = vst [vmem:[%s5259_s4 + $0x990] sm:$0xff] %v2700_v50  ;;  %v2701_v54 = vsub.f32 %v2599_v52, %v4172_v1  ;;  %2333 = vst [vmem:[%s5259_s4 + $0x7f0] sm:$0xff] %v2277_v51  ;;  %v2278_v55 = vsub.f32 %v2182_v53, %v4715_v49 }
 0x2c8   :  { %v2603_v56 = vpop.f32.mrf.mxu0  ;;  %v2186_v57 = vpop.f32.mrf.mxu1 }
 0x2c9   :  { %2757 = vst.msk [vmem:[%s5259_s4 + $0x998] sm:$0xff] %vm593_vm1, %v2701_v54  ;;  %v2702_v58 = vsub.f32 %v2603_v56, %v4172_v1  ;;  %2334 = vst.msk [vmem:[%s5259_s4 + $0x7f8] sm:$0xff] %vm593_vm1, %v2278_v55  ;;  %v2279_v59 = vsub.f32 %v2186_v57, %v4715_v49 }
 0x2ca   :  { %v2605_v60 = vpop.f32.mrf.mxu0  ;;  %v2188_v61 = vpop.f32.mrf.mxu1 }
 0x2cb   :  { %2758 = vst [vmem:[%s5259_s4 + $0x9a0] sm:$0xff] %v2702_v58  ;;  %v2703_v62 = vsub.f32 %v2605_v60, %v4172_v1  ;;  %2335 = vst [vmem:[%s5259_s4 + $0x800] sm:$0xff] %v2279_v59  ;;  %v2280_v63 = vsub.f32 %v2188_v61, %v4715_v49 }
 0x2cc   :  { %v2607_v0 = vpop.f32.mrf.mxu0  ;;  %v2190_v3 = vpop.f32.mrf.mxu1 }
 0x2cd   :  { %2759 = vst.msk [vmem:[%s5259_s4 + $0x9a8] sm:$0xff] %vm593_vm1, %v2703_v62  ;;  %v2704_v5 = vsub.f32 %v2607_v0, %v4172_v1  ;;  %2336 = vst.msk [vmem:[%s5259_s4 + $0x808] sm:$0xff] %vm593_vm1, %v2280_v63  ;;  %v2281_v6 = vsub.f32 %v2190_v3, %v4715_v49 }
 0x2ce   :  { %v2609_v7 = vpop.f32.mrf.mxu0  ;;  %v2192_v2 = vpop.f32.mrf.mxu1 }
 0x2cf   :  { %2760 = vst [vmem:[%s5259_s4 + $0x9b0] sm:$0xff] %v2704_v5  ;;  %v2705_v8 = vsub.f32 %v2609_v7, %v4172_v1  ;;  %2337 = vst [vmem:[%s5259_s4 + $0x810] sm:$0xff] %v2281_v6  ;;  %v2282_v4 = vsub.f32 %v2192_v2, %v4715_v49 }
 0x2d0   :  { %v2613_v9 = vpop.f32.mrf.mxu0  ;;  %v2196_v10 = vpop.f32.mrf.mxu1 }
 0x2d1   :  { %2761 = vst.msk [vmem:[%s5259_s4 + $0x9b8] sm:$0xff] %vm593_vm1, %v2705_v8  ;;  %v2706_v11 = vsub.f32 %v2613_v9, %v4172_v1  ;;  %2338 = vst.msk [vmem:[%s5259_s4 + $0x818] sm:$0xff] %vm593_vm1, %v2282_v4  ;;  %v2283_v12 = vsub.f32 %v2196_v10, %v4715_v49 }
 0x2d2   :  { %v2615_v14 = vpop.f32.mrf.mxu0  ;;  %v2198_v15 = vpop.f32.mrf.mxu1 }
 0x2d3   :  { %2762 = vst [vmem:[%s5259_s4 + $0x9c0] sm:$0xff] %v2706_v11  ;;  %v2707_v16 = vsub.f32 %v2615_v14, %v4172_v1  ;;  %2339 = vst [vmem:[%s5259_s4 + $0x820] sm:$0xff] %v2283_v12  ;;  %v2284_v17 = vsub.f32 %v2198_v15, %v4715_v49 }
 0x2d4   :  { %v2617_v18 = vpop.f32.mrf.mxu0  ;;  %v2200_v19 = vpop.f32.mrf.mxu1 }
 0x2d5   :  { %2763 = vst.msk [vmem:[%s5259_s4 + $0x9c8] sm:$0xff] %vm593_vm1, %v2707_v16  ;;  %v2708_v20 = vsub.f32 %v2617_v18, %v4172_v1  ;;  %2340 = vst.msk [vmem:[%s5259_s4 + $0x828] sm:$0xff] %vm593_vm1, %v2284_v17  ;;  %v2285_v21 = vsub.f32 %v2200_v19, %v4715_v49 }
 0x2d6   :  { %v2619_v22 = vpop.f32.mrf.mxu0  ;;  %v2202_v23 = vpop.f32.mrf.mxu1 }
 0x2d7   :  { %2764 = vst [vmem:[%s5259_s4 + $0x9d0] sm:$0xff] %v2708_v20  ;;  %v2709_v24 = vsub.f32 %v2619_v22, %v4172_v1  ;;  %2341 = vst [vmem:[%s5259_s4 + $0x830] sm:$0xff] %v2285_v21  ;;  %v2286_v25 = vsub.f32 %v2202_v23, %v4715_v49 }
 0x2d8   :  { %v2623_v26 = vpop.f32.mrf.mxu0  ;;  %v2206_v27 = vpop.f32.mrf.mxu1 }
 0x2d9   :  { %2765 = vst.msk [vmem:[%s5259_s4 + $0x9d8] sm:$0xff] %vm593_vm1, %v2709_v24  ;;  %v2710_v13 = vsub.f32 %v2623_v26, %v4172_v1  ;;  %2342 = vst.msk [vmem:[%s5259_s4 + $0x838] sm:$0xff] %vm593_vm1, %v2286_v25  ;;  %v2287_v28 = vsub.f32 %v2206_v27, %v4715_v49 }
 0x2da   :  { %v2625_v29 = vpop.f32.mrf.mxu0  ;;  %v2208_v30 = vpop.f32.mrf.mxu1 }
 0x2db   :  { %2766 = vst [vmem:[%s5259_s4 + $0x9e0] sm:$0xff] %v2710_v13  ;;  %v2711_v31 = vsub.f32 %v2625_v29, %v4172_v1  ;;  %2343 = vst [vmem:[%s5259_s4 + $0x840] sm:$0xff] %v2287_v28  ;;  %v2288_v32 = vsub.f32 %v2208_v30, %v4715_v49 }
 0x2dc   :  { %v2627_v33 = vpop.f32.mrf.mxu0  ;;  %v2210_v34 = vpop.f32.mrf.mxu1 }
 0x2dd   :  { %2767 = vst.msk [vmem:[%s5259_s4 + $0x9e8] sm:$0xff] %vm593_vm1, %v2711_v31  ;;  %v2712_v35 = vsub.f32 %v2627_v33, %v4172_v1  ;;  %2344 = vst.msk [vmem:[%s5259_s4 + $0x848] sm:$0xff] %vm593_vm1, %v2288_v32  ;;  %v2289_v36 = vsub.f32 %v2210_v34, %v4715_v49 }
 0x2de   :  { %v2629_v37 = vpop.f32.mrf.mxu0  ;;  %v2212_v38 = vpop.f32.mrf.mxu1 }
 0x2df   :  { %2768 = vst [vmem:[%s5259_s4 + $0x9f0] sm:$0xff] %v2712_v35  ;;  %v2713_v39 = vsub.f32 %v2629_v37, %v4172_v1  ;;  %2345 = vst [vmem:[%s5259_s4 + $0x850] sm:$0xff] %v2289_v36  ;;  %v2290_v40 = vsub.f32 %v2212_v38, %v4715_v49 }
 0x2e0   :  { %v2633_v41 = vpop.f32.mrf.mxu0  ;;  %v2216_v42 = vpop.f32.mrf.mxu1 }
 0x2e1   :  { %2769 = vst.msk [vmem:[%s5259_s4 + $0x9f8] sm:$0xff] %vm593_vm1, %v2713_v39  ;;  %v2714_v43 = vsub.f32 %v2633_v41, %v4172_v1  ;;  %2346 = vst.msk [vmem:[%s5259_s4 + $0x858] sm:$0xff] %vm593_vm1, %v2290_v40  ;;  %v2291_v44 = vsub.f32 %v2216_v42, %v4715_v49 }
 0x2e2   :  { %v2635_v45 = vpop.f32.mrf.mxu0  ;;  %v2218_v46 = vpop.f32.mrf.mxu1 }
 0x2e3   :  { %2770 = vst [vmem:[%s5259_s4 + $0xa00] sm:$0xff] %v2714_v43  ;;  %v2715_v47 = vsub.f32 %v2635_v45, %v4172_v1  ;;  %2347 = vst [vmem:[%s5259_s4 + $0x860] sm:$0xff] %v2291_v44  ;;  %v2292_v48 = vsub.f32 %v2218_v46, %v4715_v49 }
 0x2e4   :  { %v2637_v50 = vpop.f32.mrf.mxu0  ;;  %v2220_v51 = vpop.f32.mrf.mxu1 }
 0x2e5   :  { %2771 = vst.msk [vmem:[%s5259_s4 + $0xa08] sm:$0xff] %vm593_vm1, %v2715_v47  ;;  %v2716_v52 = vsub.f32 %v2637_v50, %v4172_v1  ;;  %2348 = vst.msk [vmem:[%s5259_s4 + $0x868] sm:$0xff] %vm593_vm1, %v2292_v48  ;;  %v2293_v53 = vsub.f32 %v2220_v51, %v4715_v49 }
 0x2e6   :  { %v2639_v54 = vpop.f32.mrf.mxu0  ;;  %v2222_v55 = vpop.f32.mrf.mxu1 }
 0x2e7   :  { %2772 = vst [vmem:[%s5259_s4 + $0xa10] sm:$0xff] %v2716_v52  ;;  %v2717_v56 = vsub.f32 %v2639_v54, %v4172_v1  ;;  %2349 = vst [vmem:[%s5259_s4 + $0x870] sm:$0xff] %v2293_v53  ;;  %v2294_v57 = vsub.f32 %v2222_v55, %v4715_v49 }
 0x2e8   :  { %v2643_v58 = vpop.f32.mrf.mxu0  ;;  %v2226_v59 = vpop.f32.mrf.mxu1 }
 0x2e9   :  { %2773 = vst.msk [vmem:[%s5259_s4 + $0xa18] sm:$0xff] %vm593_vm1, %v2717_v56  ;;  %v2718_v60 = vsub.f32 %v2643_v58, %v4172_v1  ;;  %2350 = vst.msk [vmem:[%s5259_s4 + $0x878] sm:$0xff] %vm593_vm1, %v2294_v57  ;;  %v2295_v61 = vsub.f32 %v2226_v59, %v4715_v49 }
 0x2ea   :  { %v2645_v62 = vpop.f32.mrf.mxu0  ;;  %v2228_v63 = vpop.f32.mrf.mxu1 }
 0x2eb   :  { %2774 = vst [vmem:[%s5259_s4 + $0xa20] sm:$0xff] %v2718_v60  ;;  %v2719_v0 = vsub.f32 %v2645_v62, %v4172_v1  ;;  %2351 = vst [vmem:[%s5259_s4 + $0x880] sm:$0xff] %v2295_v61  ;;  %v2296_v3 = vsub.f32 %v2228_v63, %v4715_v49 }
 0x2ec   :  { %v2647_v5 = vpop.f32.mrf.mxu0  ;;  %v2230_v6 = vpop.f32.mrf.mxu1 }
 0x2ed   :  { %2775 = vst.msk [vmem:[%s5259_s4 + $0xa28] sm:$0xff] %vm593_vm1, %v2719_v0  ;;  %v2720_v7 = vsub.f32 %v2647_v5, %v4172_v1  ;;  %2352 = vst.msk [vmem:[%s5259_s4 + $0x888] sm:$0xff] %vm593_vm1, %v2296_v3  ;;  %v2297_v2 = vsub.f32 %v2230_v6, %v4715_v49 }
 0x2ee   :  { %v2649_v8 = vpop.f32.mrf.mxu0  ;;  %v2232_v4 = vpop.f32.mrf.mxu1 }
 0x2ef   :  { %2776 = vst [vmem:[%s5259_s4 + $0xa30] sm:$0xff] %v2720_v7  ;;  %v2721_v9 = vsub.f32 %v2649_v8, %v4172_v1  ;;  %2353 = vst [vmem:[%s5259_s4 + $0x890] sm:$0xff] %v2297_v2  ;;  %v2298_v10 = vsub.f32 %v2232_v4, %v4715_v49 }
 0x2f0   :  { %v2653_v11 = vpop.f32.mrf.mxu0  ;;  %v2236_v12 = vpop.f32.mrf.mxu1 }
 0x2f1   :  { %2777 = vst.msk [vmem:[%s5259_s4 + $0xa38] sm:$0xff] %vm593_vm1, %v2721_v9  ;;  %v2722_v14 = vsub.f32 %v2653_v11, %v4172_v1  ;;  %2354 = vst.msk [vmem:[%s5259_s4 + $0x898] sm:$0xff] %vm593_vm1, %v2298_v10  ;;  %v2299_v15 = vsub.f32 %v2236_v12, %v4715_v49 }
 0x2f2   :  { %v2655_v16 = vpop.f32.mrf.mxu0  ;;  %v2238_v17 = vpop.f32.mrf.mxu1 }
 0x2f3   :  { %2778 = vst [vmem:[%s5259_s4 + $0xa40] sm:$0xff] %v2722_v14  ;;  %v2723_v18 = vsub.f32 %v2655_v16, %v4172_v1  ;;  %2355 = vst [vmem:[%s5259_s4 + $0x8a0] sm:$0xff] %v2299_v15  ;;  %v2300_v19 = vsub.f32 %v2238_v17, %v4715_v49 }
 0x2f4   :  { %v2657_v20 = vpop.f32.mrf.mxu0  ;;  %v2240_v21 = vpop.f32.mrf.mxu1 }
 0x2f5   :  { %2779 = vst.msk [vmem:[%s5259_s4 + $0xa48] sm:$0xff] %vm593_vm1, %v2723_v18  ;;  %v2724_v22 = vsub.f32 %v2657_v20, %v4172_v1  ;;  %2356 = vst.msk [vmem:[%s5259_s4 + $0x8a8] sm:$0xff] %vm593_vm1, %v2300_v19  ;;  %v2301_v23 = vsub.f32 %v2240_v21, %v4715_v49 }
 0x2f6   :  { %v2659_v24 = vpop.f32.mrf.mxu0  ;;  %v2242_v25 = vpop.f32.mrf.mxu1 }
 0x2f7   :  { %2780 = vst [vmem:[%s5259_s4 + $0xa50] sm:$0xff] %v2724_v22  ;;  %v2725_v26 = vsub.f32 %v2659_v24, %v4172_v1  ;;  %2357 = vst [vmem:[%s5259_s4 + $0x8b0] sm:$0xff] %v2301_v23  ;;  %v2302_v27 = vsub.f32 %v2242_v25, %v4715_v49 }
 0x2f8   :  { %v2663_v13 = vpop.f32.mrf.mxu0 }
 0x2f9   :  { %2781 = vst.msk [vmem:[%s5259_s4 + $0xa58] sm:$0xff] %vm593_vm1, %v2725_v26  ;;  %v2726_v28 = vsub.f32 %v2663_v13, %v4172_v1  ;;  %2358 = vst.msk [vmem:[%s5259_s4 + $0x8b8] sm:$0xff] %vm593_vm1, %v2302_v27 }
 0x2fa   :  { %v2665_v29 = vpop.f32.mrf.mxu0 }
 0x2fb   :  { %2782 = vst [vmem:[%s5259_s4 + $0xa60] sm:$0xff] %v2726_v28  ;;  %v2727_v49 = vsub.f32 %v2665_v29, %v4172_v1 }
 0x2fc   :  { %v2667_v30 = vpop.f32.mrf.mxu0 }
 0x2fd   :  { %2783 = vst.msk [vmem:[%s5259_s4 + $0xa68] sm:$0xff] %vm593_vm1, %v2727_v49  ;;  %v2728_v31 = vsub.f32 %v2667_v30, %v4172_v1 }
 0x2fe   :  { %v2669_v32 = vpop.f32.mrf.mxu0 }
 0x2ff   :  { %2784 = vst [vmem:[%s5259_s4 + $0xa70] sm:$0xff] %v2728_v31  ;;  %v2729_v33 = vsub.f32 %v2669_v32, %v4172_v1 }
 0x301   :  { %2785 = vst.msk [vmem:[%s5259_s4 + $0xa78] sm:$0xff] %vm593_vm1, %v2729_v33 }
 0x302   :  { %2790 = vsyncpa [#allocation3], 1 }
 0x303   :  { %2791 = vsyncpa [#allocation4], 1 }

</bundles_post_ra>
